<compile_context>
chip_gen: v7x
topology: tpu7x:2x2x1
jax: 0.10.0
libtpu: 0.0.40
codegen_flags: <defaults>
</compile_context>

<pallas_src>
import functools

import jax
import jax.numpy as jnp
from jax.experimental import pallas as pl
from jax.experimental.pallas import tpu as pltpu


def _round_up(x, m):
    return (x + m - 1) // m * m


def _compiler_params(n_axes, block_bytes):
    # double-buffered blocks + headroom; clamp to [32 MiB, 64 MiB] so the limit stays
    # above the scoped default everywhere yet inside v7x's 64 MiB physical VMEM.
    limit = int(min(max(4 * block_bytes, 32 << 20), 64 << 20))
    return pltpu.CompilerParams(
        dimension_semantics=("parallel",) * n_axes,
        vmem_limit_bytes=limit,
    )


def _fold_bn(bn):
    gamma, beta, mean, var, eps = bn
    scale = gamma / jnp.sqrt(var + eps)
    shift = beta - mean * scale
    return scale, shift


def _chan_row(v, c):
    return v.reshape(1, c).astype(jnp.float32)


# ---------------------------------------------------------------------------
# conv1: 3x3 stride-2 conv + BN + PReLU, Cin=3.
# Wrapper-side im2col (only 9x of a 3-channel tensor) -> one K=27 matmul per tile.
# ---------------------------------------------------------------------------
def _conv1_kernel(x_ref, w_ref, sc_ref, sh_ref, al_ref, o_ref):
    y = jnp.dot(x_ref[0], w_ref[...], preferred_element_type=jnp.float32)
    y = y * sc_ref[...] + sh_ref[...]                       # folded BN (f32)
    o_ref[0] = jnp.where(y >= 0.0, y, al_ref[...] * y).astype(o_ref.dtype)


def conv1_3x3_s2_bn_prelu(x_nhwc, w_oihw, bn, alpha, *, out_dtype=jnp.bfloat16):
    n, h, w, cin = x_nhwc.shape
    cout = w_oihw.shape[0]
    assert h % 2 == 0 and w % 2 == 0, "stride-2 stand-in expects even spatial dims"
    ho, wo = h // 2, w // 2
    k = 9 * cin

    xp = jnp.pad(x_nhwc, ((0, 0), (1, 1), (1, 1), (0, 0)))
    cols = [xp[:, i:i + 2 * ho:2, j:j + 2 * wo:2, :]
            for i in range(3) for j in range(3)]
    patches = jnp.concatenate(cols, axis=-1).reshape(n, ho * wo, k).astype(jnp.bfloat16)

    rows = ho * wo
    tr = min(512, _round_up(rows, 8))          # row tile (multiple of 8)
    rows_p = _round_up(rows, tr)
    if rows_p != rows:
        patches = jnp.pad(patches, ((0, 0), (0, rows_p - rows), (0, 0)))

    # weight rows ordered (i, j, cin) to match the patch concat order
    wk = jnp.transpose(w_oihw, (2, 3, 1, 0)).reshape(k, cout).astype(jnp.bfloat16)
    sc, sh = _fold_bn(bn)
    sc, sh, al = _chan_row(sc, cout), _chan_row(sh, cout), _chan_row(alpha, cout)

    block_bytes = tr * k * 2 + k * cout * 2 + tr * cout * 2 + 3 * cout * 4
    out = pl.pallas_call(
        _conv1_kernel,
        out_shape=jax.ShapeDtypeStruct((n, rows_p, cout), out_dtype),
        grid=(n, rows_p // tr),
        in_specs=[
            pl.BlockSpec((1, tr, k), lambda b, r: (b, r, 0)),
            pl.BlockSpec((k, cout), lambda b, r: (0, 0)),
            pl.BlockSpec((1, cout), lambda b, r: (0, 0)),
            pl.BlockSpec((1, cout), lambda b, r: (0, 0)),
            pl.BlockSpec((1, cout), lambda b, r: (0, 0)),
        ],
        out_specs=pl.BlockSpec((1, tr, cout), lambda b, r: (b, r, 0)),
        compiler_params=_compiler_params(2, block_bytes),
    )(patches, wk, sc, sh, al)
    return out[:, :rows].reshape(n, ho, wo, cout)


# ---------------------------------------------------------------------------
# conv2: 3x3 stride-2 conv + BN + PReLU (Cin=Cout=64) fused with the OutputLayer
# (Dropout2d identity; 1x1 conv + BN, no relu).
#
# The padded input is packed so the 4 stride-2 polyphases sit side-by-side on the
# lane axis: row t = r*wp2 + c holds [xp[2r,2c,:], xp[2r,2c+1,:], xp[2r+1,2c,:],
# xp[2r+1,2c+1,:]] (256 lanes).  Output pixel (y, x) (flat t = y*wp2 + x) then
# needs only 4 contiguous row windows, starting at offsets {0, 1, wp2, wp2+1};
# each window covers 4 / 2 / 2 / 1 of the 9 taps via a zero-padded (256, 64)
# group weight.  => four full-depth K=256 MXU matmuls, no im2col, no copies.
# Rows with x >= wo are junk and get zero weight in the upsample's Rw matrix.
# ---------------------------------------------------------------------------
def _conv2_out_fused_kernel(xc_ref, wg_ref, sc2_ref, sh2_ref, al2_ref,
                            w3_ref, sc3_ref, sh3_ref, o_ref, *, wp2, ho):
    l = ho * wp2
    cmid = wg_ref.shape[2]
    starts = (0, 1, wp2, wp2 + 1)
    acc = jnp.zeros((l, cmid), jnp.float32)
    for g in range(4):
        xt = xc_ref[0, pl.ds(starts[g], l), :]              # (l, 256) bf16, no copy
        acc = acc + jnp.dot(xt, wg_ref[g], preferred_element_type=jnp.float32)
    y = acc * sc2_ref[...] + sh2_ref[...]                   # folded BN2 (f32)
    y = jnp.where(y >= 0.0, y, al2_ref[...] * y)            # PReLU
    z = jnp.dot(y.astype(jnp.bfloat16), w3_ref[...],        # fused 1x1 conv
                preferred_element_type=jnp.float32)
    z = z * sc3_ref[...] + sh3_ref[...]                     # folded BN3 (no relu)
    # lane-dense, plane-major output (c3, l): small XLU transpose of the (l, c3)
    # result rides a slot the MXU is not using.
    o_ref[0] = jnp.transpose(z, (1, 0)).astype(o_ref.dtype)


def conv2_fused_outputlayer(f1_nhwc, w2_oihw, bn2, alpha2, w3_oihw, bn3,
                            *, out_dtype=jnp.bfloat16):
    n, h1, w1, cin = f1_nhwc.shape
    cout = w2_oihw.shape[0]
    c3 = w3_oihw.shape[0]
    assert h1 % 2 == 0 and w1 % 2 == 0
    ho, wo = h1 // 2, w1 // 2
    hp2, wp2 = (h1 + 2) // 2, (w1 + 2) // 2
    l = ho * wp2

    # combined polyphase layout (n, s, 4*cin), phases on the lane axis
    xp = jnp.pad(f1_nhwc, ((0, 0), (1, 1), (1, 1), (0, 0)))
    xc = xp.reshape(n, hp2, 2, wp2, 2, cin).transpose(0, 1, 3, 2, 4, 5)
    xc = xc.reshape(n, hp2 * wp2, 4 * cin)
    s = _round_up(hp2 * wp2 + wp2 + 2, 8)       # keeps the farthest window in bounds
    xc = jnp.pad(xc, ((0, 0), (0, s - hp2 * wp2), (0, 0))).astype(jnp.bfloat16)

    # group weights: group g = 2*(i//2)+(j//2) (row-window), phase block
    # p = 2*(i%2)+(j%2) on the contraction axis; unused phase blocks stay zero.
    wg = jnp.zeros((4, 4 * cin, cout), jnp.float32)
    for i in range(3):
        for j in range(3):
            g = 2 * (i // 2) + (j // 2)
            p = 2 * (i % 2) + (j % 2)
            wg = wg.at[g, p * cin:(p + 1) * cin, :].set(
                jnp.transpose(w2_oihw[:, :, i, j], (1, 0)))
    wg = wg.astype(jnp.bfloat16)

    sc2, sh2 = _fold_bn(bn2)
    sc2, sh2 = _chan_row(sc2, cout), _chan_row(sh2, cout)
    al2 = _chan_row(alpha2, cout)
    w3 = jnp.transpose(w3_oihw[:, :, 0, 0], (1, 0)).astype(jnp.bfloat16)  # (cout, c3)
    sc3, sh3 = _fold_bn(bn3)
    sc3, sh3 = _chan_row(sc3, c3), _chan_row(sh3, c3)

    kern = functools.partial(_conv2_out_fused_kernel, wp2=wp2, ho=ho)
    block_bytes = (s * 4 * cin * 2 + 4 * 4 * cin * cout * 2 + c3 * l * 2
                   + l * cout * 4 + cout * c3 * 2)
    # TODO(synk): for large images, row-tile this kernel (grid (n, ho//tr)) with a
    # one-polyphase-row halo (pl.Element-indexed input or wrapper-materialised halo
    # tiles) so the (l, cout) f32 accumulator and the polyphase block fit v7x's
    # 64 MiB VMEM and the DMA pipeline has real depth.
    out = pl.pallas_call(
        kern,
        out_shape=jax.ShapeDtypeStruct((n, c3, l), out_dtype),
        grid=(n,),
        in_specs=[
            pl.BlockSpec((1, s, 4 * cin), lambda b: (b, 0, 0)),
            pl.BlockSpec((4, 4 * cin, cout), lambda b: (0, 0, 0)),
            pl.BlockSpec((1, cout), lambda b: (0, 0)),
            pl.BlockSpec((1, cout), lambda b: (0, 0)),
            pl.BlockSpec((1, cout), lambda b: (0, 0)),
            pl.BlockSpec((cout, c3), lambda b: (0, 0)),
            pl.BlockSpec((1, c3), lambda b: (0, 0)),
            pl.BlockSpec((1, c3), lambda b: (0, 0)),
        ],
        out_specs=pl.BlockSpec((1, c3, l), lambda b: (b, 0, 0)),
        compiler_params=_compiler_params(1, block_bytes),
    )(xc, wg, sc2, sh2, al2, w3, sc3, sh3)
    # plane-major (n, c3, ho, wp2); junk columns x >= wo are handled by zero rows
    # in the upsample's Rw matrix -> no slice / transpose copy here.
    return out.reshape(n, c3, ho, wp2), wo


# ---------------------------------------------------------------------------
# Bilinear upsample (align_corners=True): out[p] = Rh @ x[p] @ Rw^T per plane,
# bf16 MXU inputs / f32 accumulation, row-tiled over out_h, no broadcast copies.
# ---------------------------------------------------------------------------
def _bilinear_kernel(x_ref, rh_ref, rwt_ref, o_ref):
    cb = x_ref.shape[0]
    rh = rh_ref[...]
    rwt = rwt_ref[...]
    for p in range(cb):                       # static unroll, plain 2-D dots
        t = jnp.dot(rh, x_ref[p], preferred_element_type=jnp.float32)
        o_ref[p] = jnp.dot(t.astype(jnp.bfloat16), rwt,
                           preferred_element_type=jnp.float32)


def _interp_matrix(out_len, in_len):
    # align_corners=True interpolation weights
    if in_len == 1 or out_len == 1:
        return jnp.zeros((out_len, in_len), jnp.float32).at[:, 0].set(1.0)
    pos = jnp.arange(out_len, dtype=jnp.float32) * (in_len - 1) / (out_len - 1)
    lo = jnp.clip(jnp.floor(pos).astype(jnp.int32), 0, in_len - 2)
    frac = pos - lo.astype(jnp.float32)
    rows = jnp.arange(out_len)
    m = jnp.zeros((out_len, in_len), jnp.float32)
    m = m.at[rows, lo].add(1.0 - frac)
    m = m.at[rows, lo + 1].add(frac)
    return m


def _pick_row_tile(n, cap=256):
    if n <= cap:
        return n
    for d in range(cap - cap % 8, 7, -8):
        if n % d == 0:
            return d
    return n


def bilinear_upsample_planes(x_pchw, valid_w, out_h, out_w, *, vmem_budget=8 << 20):
    n, c, h_in, w_in = x_pchw.shape
    planes = n * c
    rh = _interp_matrix(out_h, h_in).astype(jnp.bfloat16)
    rw = _interp_matrix(out_w, valid_w)                      # (out_w, valid_w)
    rwt = jnp.zeros((w_in, out_w), jnp.float32).at[:valid_w, :].set(rw.T)
    rwt = rwt.astype(jnp.bfloat16)                           # junk cols -> zero weight

    xf = x_pchw.reshape(planes, h_in, w_in).astype(jnp.bfloat16)
    th = _pick_row_tile(out_h)
    per_plane = h_in * w_in * 2 + th * out_w * 4 + th * w_in * 4
    cb = int(max(1, min(planes, 16, vmem_budget // max(per_plane, 1))))
    planes_p = pl.cdiv(planes, cb) * cb
    if planes_p != planes:
        xf = jnp.pad(xf, ((0, planes_p - planes), (0, 0), (0, 0)))

    block_bytes = (cb * h_in * w_in * 2 + th * h_in * 2 + w_in * out_w * 2
                   + cb * th * out_w * 4)
    out = pl.pallas_call(
        _bilinear_kernel,
        out_shape=jax.ShapeDtypeStruct((planes_p, out_h, out_w), jnp.float32),
        grid=(planes_p // cb, out_h // th),
        in_specs=[
            pl.BlockSpec((cb, h_in, w_in), lambda i, j: (i, 0, 0)),
            pl.BlockSpec((th, h_in), lambda i, j: (j, 0)),
            pl.BlockSpec((w_in, out_w), lambda i, j: (0, 0)),
        ],
        out_specs=pl.BlockSpec((cb, th, out_w), lambda i, j: (i, j, 0)),
        compiler_params=_compiler_params(2, block_bytes),
    )(xf, rh, rwt)
    return out[:planes].reshape(n, c, out_h, out_w)


# ---------------------------------------------------------------------------
# Parameters (kaiming_normal_(a=1) convs, BN identity init with running stats,
# PReLU alpha = 0.25, matching PyTorch defaults).
# ---------------------------------------------------------------------------
def _kaiming(key, shape):
    fan_in = shape[1] * shape[2] * shape[3]
    std = 1.0 / jnp.sqrt(jnp.float32(fan_in))     # a=1 -> gain 1
    return jax.random.normal(key, shape, jnp.float32) * std


def init_params(key, out_planes):
    k1, k2, k3 = jax.random.split(key, 3)
    eps = 1e-5

    def bn_identity(c):
        return (jnp.ones((c,), jnp.float32), jnp.zeros((c,), jnp.float32),
                jnp.zeros((c,), jnp.float32), jnp.ones((c,), jnp.float32), eps)

    return {
        "conv1_w": _kaiming(k1, (64, 3, 3, 3)),
        "bn1": bn_identity(64),
        "prelu1": jnp.full((64,), 0.25, jnp.float32),
        "conv2_w": _kaiming(k2, (64, 64, 3, 3)),
        "bn2": bn_identity(64),
        "prelu2": jnp.full((64,), 0.25, jnp.float32),
        # OutputLayer: ConvBnRelu(64 -> out_planes, 1x1, has_relu=False)
        "conv3_w": _kaiming(k3, (out_planes, 64, 1, 1)),
        "bn3": bn_identity(out_planes),
    }


# ---------------------------------------------------------------------------
# mynet forward
# ---------------------------------------------------------------------------
@jax.jit
def mynet_forward(params, data_nchw):
    n, cin, h, w = data_nchw.shape
    x = jnp.transpose(data_nchw, (0, 2, 3, 1))    # NCHW -> NHWC (channels on lanes)

    # TODO(synk): the Resnet18 context path is not defined in the reference source;
    # stand-in of two stride-2 ConvBnRelu blocks producing the 64-channel `feat`
    # that OutputLayer(64, out_planes) expects (feat32 is only printed upstream).
    f1 = conv1_3x3_s2_bn_prelu(x, params["conv1_w"], params["bn1"], params["prelu1"])

    # conv2 + fused OutputLayer; output is already plane-major bf16 -> the upsample
    # consumes it with no transpose/slice in between.
    feat_planes, valid_w = conv2_fused_outputlayer(
        f1, params["conv2_w"], params["bn2"], params["prelu2"],
        params["conv3_w"], params["bn3"])

    # bilinear, align_corners=True, back to the input spatial size.
    return bilinear_upsample_planes(feat_planes, valid_w, h, w)


if __name__ == "__main__":
    key = jax.random.PRNGKey(0)
    kx, kp = jax.random.split(key)

    N, Cin, H, W = 2, 3, 16, 16
    out_planes = 8

    data = jax.random.normal(kx, (N, Cin, H, W), jnp.float32)
    params = init_params(kp, out_planes)

    out = jax.block_until_ready(mynet_forward(params, data))

    assert out.shape == (N, out_planes, H, W), out.shape
    assert bool(jnp.all(jnp.isfinite(out)))
    print("KERNEL_OK")
</pallas_src>

<mosaic_0001>
module attributes {stable_mosaic.version = 11 : i64} {
  func.func private @main(%arg0: i32) attributes {dimension_semantics = [#tpu.dimension_semantics<core_parallel>], iteration_bounds = array<i64: 2>, tpu.core_type = #tpu.core_type<sc_scalar_subcore>, window_params = []} {
    return
  }
}

module attributes {stable_mosaic.version = 11 : i64} {
  func.func private @main(%arg0: i32) attributes {dimension_semantics = [#tpu.dimension_semantics<core_parallel>], iteration_bounds = array<i64: 2>, tpu.core_type = #tpu.core_type<sc_scalar_subcore>, window_params = []} {
    return
  }
}

module attributes {stable_mosaic.version = 11 : i64} {
  func.func @_conv1_kernel(%arg0: i32, %arg1: i32, %arg2: memref<1x64x27xbf16, #tpu.memory_space<vmem>>, %arg3: memref<27x64xbf16, #tpu.memory_space<vmem>>, %arg4: memref<1x64xf32, #tpu.memory_space<vmem>>, %arg5: memref<1x64xf32, #tpu.memory_space<vmem>>, %arg6: memref<1x64xf32, #tpu.memory_space<vmem>>, %arg7: memref<1x64x64xbf16, #tpu.memory_space<vmem>>) attributes {dimension_semantics = [#tpu.dimension_semantics<parallel>, #tpu.dimension_semantics<parallel>], iteration_bounds = array<i64: 2, 1>, scalar_prefetch = 0 : i64, scratch_operands = 0 : i64, tpu.core_type = #tpu.core_type<tc>, window_params = [{transform_indices = @transform_0, window_bounds = array<i64: 1, 64, 27>}, {pipeline_mode = #tpu.pipeline_mode<synchronous>, transform_indices = @transform_1, window_bounds = array<i64: 27, 64>}, {pipeline_mode = #tpu.pipeline_mode<synchronous>, transform_indices = @transform_2, window_bounds = array<i64: 1, 64>}, {pipeline_mode = #tpu.pipeline_mode<synchronous>, transform_indices = @transform_3, window_bounds = array<i64: 1, 64>}, {pipeline_mode = #tpu.pipeline_mode<synchronous>, transform_indices = @transform_4, window_bounds = array<i64: 1, 64>}, {transform_indices = @transform_5, window_bounds = array<i64: 1, 64, 64>}]} {
    %c0 = arith.constant 0 : index
    %c0_0 = arith.constant 0 : index
    %c0_1 = arith.constant 0 : index
    %0 = vector.load %arg2[%c0, %c0_0, %c0_1] : memref<1x64x27xbf16, #tpu.memory_space<vmem>>, vector<1x64x27xbf16>
    %1 = vector.shape_cast %0 : vector<1x64x27xbf16> to vector<64x27xbf16>
    %c0_2 = arith.constant 0 : index
    %c0_3 = arith.constant 0 : index
    %2 = vector.load %arg3[%c0_2, %c0_3] : memref<27x64xbf16, #tpu.memory_space<vmem>>, vector<27x64xbf16>
    %cst = arith.constant dense<0.000000e+00> : vector<64x64xf32>
    %3 = tpu.matmul %1, %2, %cst {dimension_numbers = #tpu.dot_dimension_numbers<[1], [0], [0], [1], [0, 0, 1, 1], [], []>} : vector<64x27xbf16>, vector<27x64xbf16>, vector<64x64xf32> -> vector<64x64xf32>
    %c0_4 = arith.constant 0 : index
    %c0_5 = arith.constant 0 : index
    %4 = vector.load %arg4[%c0_4, %c0_5] : memref<1x64xf32, #tpu.memory_space<vmem>>, vector<1x64xf32>
    %5 = vector.broadcast %4 : vector<1x64xf32> to vector<64x64xf32>
    %6 = arith.mulf %3, %5 : vector<64x64xf32>
    %c0_6 = arith.constant 0 : index
    %c0_7 = arith.constant 0 : index
    %7 = vector.load %arg5[%c0_6, %c0_7] : memref<1x64xf32, #tpu.memory_space<vmem>>, vector<1x64xf32>
    %8 = vector.broadcast %7 : vector<1x64xf32> to vector<64x64xf32>
    %9 = arith.addf %6, %8 : vector<64x64xf32>
    %cst_8 = arith.constant 0.000000e+00 : f32
    %10 = vector.broadcast %cst_8 : f32 to vector<64x64xf32>
    %11 = arith.cmpf oge, %9, %10 : vector<64x64xf32>
    %c0_9 = arith.constant 0 : index
    %c0_10 = arith.constant 0 : index
    %12 = vector.load %arg6[%c0_9, %c0_10] : memref<1x64xf32, #tpu.memory_space<vmem>>, vector<1x64xf32>
    %13 = vector.broadcast %12 : vector<1x64xf32> to vector<64x64xf32>
    %14 = arith.mulf %13, %9 : vector<64x64xf32>
    %15 = arith.select %11, %9, %14 : vector<64x64xi1>, vector<64x64xf32>
    %16 = arith.truncf %15 : vector<64x64xf32> to vector<64x64xbf16>
    %c0_11 = arith.constant 0 : index
    %c0_12 = arith.constant 0 : index
    %c0_13 = arith.constant 0 : index
    %17 = vector.load %arg7[%c0_11, %c0_12, %c0_13] : memref<1x64x64xbf16, #tpu.memory_space<vmem>>, vector<1x64x64xbf16>
    %18 = vector.shape_cast %17 : vector<1x64x64xbf16> to vector<64x64xbf16>
    %19 = vector.shape_cast %16 : vector<64x64xbf16> to vector<1x64x64xbf16>
    tpu.vector_store %arg7[%c0_11, %c0_12, %c0_13], %19 {strides = array<i32>} : memref<1x64x64xbf16, #tpu.memory_space<vmem>>, vector<1x64x64xbf16>,
    return
  }
  func.func @transform_0(%arg0: i32, %arg1: i32) -> (i32, i32, i32) {
    %c0_i32 = arith.constant 0 : i32
    %c0_i32_0 = arith.constant 0 : i32
    return %arg0, %arg1, %c0_i32 : i32, i32, i32
  }
  func.func @transform_1(%arg0: i32, %arg1: i32) -> (i32, i32) {
    %c0_i32 = arith.constant 0 : i32
    %c0_i32_0 = arith.constant 0 : i32
    %c0_i32_1 = arith.constant 0 : i32
    return %c0_i32, %c0_i32_0 : i32, i32
  }
  func.func @transform_2(%arg0: i32, %arg1: i32) -> (i32, i32) {
    %c0_i32 = arith.constant 0 : i32
    %c0_i32_0 = arith.constant 0 : i32
    %c0_i32_1 = arith.constant 0 : i32
    return %c0_i32, %c0_i32_0 : i32, i32
  }
  func.func @transform_3(%arg0: i32, %arg1: i32) -> (i32, i32) {
    %c0_i32 = arith.constant 0 : i32
    %c0_i32_0 = arith.constant 0 : i32
    %c0_i32_1 = arith.constant 0 : i32
    return %c0_i32, %c0_i32_0 : i32, i32
  }
  func.func @transform_4(%arg0: i32, %arg1: i32) -> (i32, i32) {
    %c0_i32 = arith.constant 0 : i32
    %c0_i32_0 = arith.constant 0 : i32
    %c0_i32_1 = arith.constant 0 : i32
    return %c0_i32, %c0_i32_0 : i32, i32
  }
  func.func @transform_5(%arg0: i32, %arg1: i32) -> (i32, i32, i32) {
    %c0_i32 = arith.constant 0 : i32
    %c0_i32_0 = arith.constant 0 : i32
    return %arg0, %arg1, %c0_i32 : i32, i32, i32
  }
}

module attributes {stable_mosaic.version = 11 : i64} {
  func.func @_conv2_out_fused_kernel(%arg0: i32, %arg1: memref<1x32x256xbf16, #tpu.memory_space<vmem>>, %arg2: memref<4x256x64xbf16, #tpu.memory_space<vmem>>, %arg3: memref<1x64xf32, #tpu.memory_space<vmem>>, %arg4: memref<1x64xf32, #tpu.memory_space<vmem>>, %arg5: memref<1x64xf32, #tpu.memory_space<vmem>>, %arg6: memref<64x8xbf16, #tpu.memory_space<vmem>>, %arg7: memref<1x8xf32, #tpu.memory_space<vmem>>, %arg8: memref<1x8xf32, #tpu.memory_space<vmem>>, %arg9: memref<1x8x20xbf16, #tpu.memory_space<vmem>>) attributes {dimension_semantics = [#tpu.dimension_semantics<parallel>], iteration_bounds = array<i64: 2>, scalar_prefetch = 0 : i64, scratch_operands = 0 : i64, tpu.core_type = #tpu.core_type<tc>, window_params = [{transform_indices = @transform_0, window_bounds = array<i64: 1, 32, 256>}, {pipeline_mode = #tpu.pipeline_mode<synchronous>, transform_indices = @transform_1, window_bounds = array<i64: 4, 256, 64>}, {pipeline_mode = #tpu.pipeline_mode<synchronous>, transform_indices = @transform_2, window_bounds = array<i64: 1, 64>}, {pipeline_mode = #tpu.pipeline_mode<synchronous>, transform_indices = @transform_3, window_bounds = array<i64: 1, 64>}, {pipeline_mode = #tpu.pipeline_mode<synchronous>, transform_indices = @transform_4, window_bounds = array<i64: 1, 64>}, {pipeline_mode = #tpu.pipeline_mode<synchronous>, transform_indices = @transform_5, window_bounds = array<i64: 64, 8>}, {pipeline_mode = #tpu.pipeline_mode<synchronous>, transform_indices = @transform_6, window_bounds = array<i64: 1, 8>}, {pipeline_mode = #tpu.pipeline_mode<synchronous>, transform_indices = @transform_7, window_bounds = array<i64: 1, 8>}, {transform_indices = @transform_8, window_bounds = array<i64: 1, 8, 20>}]} {
    %cst = arith.constant 0.000000e+00 : f32
    %0 = vector.broadcast %cst : f32 to vector<20x64xf32>
    %c0 = arith.constant 0 : index
    %c0_0 = arith.constant 0 : index
    %c0_1 = arith.constant 0 : index
    %1 = vector.load %arg1[%c0, %c0_0, %c0_1] : memref<1x32x256xbf16, #tpu.memory_space<vmem>>, vector<1x20x256xbf16>
    %2 = vector.shape_cast %1 : vector<1x20x256xbf16> to vector<20x256xbf16>
    %c0_2 = arith.constant 0 : index
    %c0_3 = arith.constant 0 : index
    %c0_4 = arith.constant 0 : index
    %3 = vector.load %arg2[%c0_2, %c0_3, %c0_4] : memref<4x256x64xbf16, #tpu.memory_space<vmem>>, vector<1x256x64xbf16>
    %4 = vector.shape_cast %3 : vector<1x256x64xbf16> to vector<256x64xbf16>
    %cst_5 = arith.constant dense<0.000000e+00> : vector<20x64xf32>
    %5 = tpu.matmul %2, %4, %cst_5 {dimension_numbers = #tpu.dot_dimension_numbers<[1], [0], [0], [1], [0, 0, 1, 1], [], []>} : vector<20x256xbf16>, vector<256x64xbf16>, vector<20x64xf32> -> vector<20x64xf32>
    %6 = arith.addf %0, %5 : vector<20x64xf32>
    %c0_6 = arith.constant 0 : index
    %c1 = arith.constant 1 : index
    %c0_7 = arith.constant 0 : index
    %7 = vector.load %arg1[%c0_6, %c1, %c0_7] : memref<1x32x256xbf16, #tpu.memory_space<vmem>>, vector<1x20x256xbf16>
    %8 = vector.shape_cast %7 : vector<1x20x256xbf16> to vector<20x256xbf16>
    %c1_8 = arith.constant 1 : index
    %c0_9 = arith.constant 0 : index
    %c0_10 = arith.constant 0 : index
    %9 = vector.load %arg2[%c1_8, %c0_9, %c0_10] : memref<4x256x64xbf16, #tpu.memory_space<vmem>>, vector<1x256x64xbf16>
    %10 = vector.shape_cast %9 : vector<1x256x64xbf16> to vector<256x64xbf16>
    %cst_11 = arith.constant dense<0.000000e+00> : vector<20x64xf32>
    %11 = tpu.matmul %8, %10, %cst_11 {dimension_numbers = #tpu.dot_dimension_numbers<[1], [0], [0], [1], [0, 0, 1, 1], [], []>} : vector<20x256xbf16>, vector<256x64xbf16>, vector<20x64xf32> -> vector<20x64xf32>
    %12 = arith.addf %6, %11 : vector<20x64xf32>
    %c0_12 = arith.constant 0 : index
    %c5 = arith.constant 5 : index
    %c0_13 = arith.constant 0 : index
    %13 = vector.load %arg1[%c0_12, %c5, %c0_13] : memref<1x32x256xbf16, #tpu.memory_space<vmem>>, vector<1x20x256xbf16>
    %14 = vector.shape_cast %13 : vector<1x20x256xbf16> to vector<20x256xbf16>
    %c2 = arith.constant 2 : index
    %c0_14 = arith.constant 0 : index
    %c0_15 = arith.constant 0 : index
    %15 = vector.load %arg2[%c2, %c0_14, %c0_15] : memref<4x256x64xbf16, #tpu.memory_space<vmem>>, vector<1x256x64xbf16>
    %16 = vector.shape_cast %15 : vector<1x256x64xbf16> to vector<256x64xbf16>
    %cst_16 = arith.constant dense<0.000000e+00> : vector<20x64xf32>
    %17 = tpu.matmul %14, %16, %cst_16 {dimension_numbers = #tpu.dot_dimension_numbers<[1], [0], [0], [1], [0, 0, 1, 1], [], []>} : vector<20x256xbf16>, vector<256x64xbf16>, vector<20x64xf32> -> vector<20x64xf32>
    %18 = arith.addf %12, %17 : vector<20x64xf32>
    %c0_17 = arith.constant 0 : index
    %c6 = arith.constant 6 : index
    %c0_18 = arith.constant 0 : index
    %19 = vector.load %arg1[%c0_17, %c6, %c0_18] : memref<1x32x256xbf16, #tpu.memory_space<vmem>>, vector<1x20x256xbf16>
    %20 = vector.shape_cast %19 : vector<1x20x256xbf16> to vector<20x256xbf16>
    %c3 = arith.constant 3 : index
    %c0_19 = arith.constant 0 : index
    %c0_20 = arith.constant 0 : index
    %21 = vector.load %arg2[%c3, %c0_19, %c0_20] : memref<4x256x64xbf16, #tpu.memory_space<vmem>>, vector<1x256x64xbf16>
    %22 = vector.shape_cast %21 : vector<1x256x64xbf16> to vector<256x64xbf16>
    %cst_21 = arith.constant dense<0.000000e+00> : vector<20x64xf32>
    %23 = tpu.matmul %20, %22, %cst_21 {dimension_numbers = #tpu.dot_dimension_numbers<[1], [0], [0], [1], [0, 0, 1, 1], [], []>} : vector<20x256xbf16>, vector<256x64xbf16>, vector<20x64xf32> -> vector<20x64xf32>
    %24 = arith.addf %18, %23 : vector<20x64xf32>
    %c0_22 = arith.constant 0 : index
    %c0_23 = arith.constant 0 : index
    %25 = vector.load %arg3[%c0_22, %c0_23] : memref<1x64xf32, #tpu.memory_space<vmem>>, vector<1x64xf32>
    %26 = vector.broadcast %25 : vector<1x64xf32> to vector<20x64xf32>
    %27 = arith.mulf %24, %26 : vector<20x64xf32>
    %c0_24 = arith.constant 0 : index
    %c0_25 = arith.constant 0 : index
    %28 = vector.load %arg4[%c0_24, %c0_25] : memref<1x64xf32, #tpu.memory_space<vmem>>, vector<1x64xf32>
    %29 = vector.broadcast %28 : vector<1x64xf32> to vector<20x64xf32>
    %30 = arith.addf %27, %29 : vector<20x64xf32>
    %cst_26 = arith.constant 0.000000e+00 : f32
    %31 = vector.broadcast %cst_26 : f32 to vector<20x64xf32>
    %32 = arith.cmpf oge, %30, %31 : vector<20x64xf32>
    %c0_27 = arith.constant 0 : index
    %c0_28 = arith.constant 0 : index
    %33 = vector.load %arg5[%c0_27, %c0_28] : memref<1x64xf32, #tpu.memory_space<vmem>>, vector<1x64xf32>
    %34 = vector.broadcast %33 : vector<1x64xf32> to vector<20x64xf32>
    %35 = arith.mulf %34, %30 : vector<20x64xf32>
    %36 = arith.select %32, %30, %35 : vector<20x64xi1>, vector<20x64xf32>
    %37 = arith.truncf %36 : vector<20x64xf32> to vector<20x64xbf16>
    %c0_29 = arith.constant 0 : index
    %c0_30 = arith.constant 0 : index
    %38 = vector.load %arg6[%c0_29, %c0_30] : memref<64x8xbf16, #tpu.memory_space<vmem>>, vector<64x8xbf16>
    %cst_31 = arith.constant dense<0.000000e+00> : vector<20x8xf32>
    %39 = tpu.matmul %37, %38, %cst_31 {dimension_numbers = #tpu.dot_dimension_numbers<[1], [0], [0], [1], [0, 0, 1, 1], [], []>} : vector<20x64xbf16>, vector<64x8xbf16>, vector<20x8xf32> -> vector<20x8xf32>
    %c0_32 = arith.constant 0 : index
    %c0_33 = arith.constant 0 : index
    %40 = vector.load %arg7[%c0_32, %c0_33] : memref<1x8xf32, #tpu.memory_space<vmem>>, vector<1x8xf32>
    %41 = vector.broadcast %40 : vector<1x8xf32> to vector<20x8xf32>
    %42 = arith.mulf %39, %41 : vector<20x8xf32>
    %c0_34 = arith.constant 0 : index
    %c0_35 = arith.constant 0 : index
    %43 = vector.load %arg8[%c0_34, %c0_35] : memref<1x8xf32, #tpu.memory_space<vmem>>, vector<1x8xf32>
    %44 = vector.broadcast %43 : vector<1x8xf32> to vector<20x8xf32>
    %45 = arith.addf %42, %44 : vector<20x8xf32>
    %46 = tpu.transpose %45, [1, 0] : vector<20x8xf32> -> vector<8x20xf32>
    %47 = arith.truncf %46 : vector<8x20xf32> to vector<8x20xbf16>
    %c0_36 = arith.constant 0 : index
    %c0_37 = arith.constant 0 : index
    %c0_38 = arith.constant 0 : index
    %48 = vector.load %arg9[%c0_36, %c0_37, %c0_38] : memref<1x8x20xbf16, #tpu.memory_space<vmem>>, vector<1x8x20xbf16>
    %49 = vector.shape_cast %48 : vector<1x8x20xbf16> to vector<8x20xbf16>
    %50 = vector.shape_cast %47 : vector<8x20xbf16> to vector<1x8x20xbf16>
    tpu.vector_store %arg9[%c0_36, %c0_37, %c0_38], %50 {strides = array<i32>} : memref<1x8x20xbf16, #tpu.memory_space<vmem>>, vector<1x8x20xbf16>,
    return
  }
  func.func @transform_0(%arg0: i32) -> (i32, i32, i32) {
    %c0_i32 = arith.constant 0 : i32
    %c0_i32_0 = arith.constant 0 : i32
    %c0_i32_1 = arith.constant 0 : i32
    return %arg0, %c0_i32, %c0_i32_0 : i32, i32, i32
  }
  func.func @transform_1(%arg0: i32) -> (i32, i32, i32) {
    %c0_i32 = arith.constant 0 : i32
    %c0_i32_0 = arith.constant 0 : i32
    %c0_i32_1 = arith.constant 0 : i32
    %c0_i32_2 = arith.constant 0 : i32
    return %c0_i32, %c0_i32_0, %c0_i32_1 : i32, i32, i32
  }
  func.func @transform_2(%arg0: i32) -> (i32, i32) {
    %c0_i32 = arith.constant 0 : i32
    %c0_i32_0 = arith.constant 0 : i32
    %c0_i32_1 = arith.constant 0 : i32
    return %c0_i32, %c0_i32_0 : i32, i32
  }
  func.func @transform_3(%arg0: i32) -> (i32, i32) {
    %c0_i32 = arith.constant 0 : i32
    %c0_i32_0 = arith.constant 0 : i32
    %c0_i32_1 = arith.constant 0 : i32
    return %c0_i32, %c0_i32_0 : i32, i32
  }
  func.func @transform_4(%arg0: i32) -> (i32, i32) {
    %c0_i32 = arith.constant 0 : i32
    %c0_i32_0 = arith.constant 0 : i32
    %c0_i32_1 = arith.constant 0 : i32
    return %c0_i32, %c0_i32_0 : i32, i32
  }
  func.func @transform_5(%arg0: i32) -> (i32, i32) {
    %c0_i32 = arith.constant 0 : i32
    %c0_i32_0 = arith.constant 0 : i32
    %c0_i32_1 = arith.constant 0 : i32
    return %c0_i32, %c0_i32_0 : i32, i32
  }
  func.func @transform_6(%arg0: i32) -> (i32, i32) {
    %c0_i32 = arith.constant 0 : i32
    %c0_i32_0 = arith.constant 0 : i32
    %c0_i32_1 = arith.constant 0 : i32
    return %c0_i32, %c0_i32_0 : i32, i32
  }
  func.func @transform_7(%arg0: i32) -> (i32, i32) {
    %c0_i32 = arith.constant 0 : i32
    %c0_i32_0 = arith.constant 0 : i32
    %c0_i32_1 = arith.constant 0 : i32
    return %c0_i32, %c0_i32_0 : i32, i32
  }
  func.func @transform_8(%arg0: i32) -> (i32, i32, i32) {
    %c0_i32 = arith.constant 0 : i32
    %c0_i32_0 = arith.constant 0 : i32
    %c0_i32_1 = arith.constant 0 : i32
    return %arg0, %c0_i32, %c0_i32_0 : i32, i32, i32
  }
}

module attributes {stable_mosaic.version = 11 : i64} {
  func.func @_bilinear_kernel(%arg0: i32, %arg1: i32, %arg2: memref<16x4x5xbf16, #tpu.memory_space<vmem>>, %arg3: memref<16x4xbf16, #tpu.memory_space<vmem>>, %arg4: memref<5x16xbf16, #tpu.memory_space<vmem>>, %arg5: memref<16x16x16xf32, #tpu.memory_space<vmem>>) attributes {dimension_semantics = [#tpu.dimension_semantics<parallel>, #tpu.dimension_semantics<parallel>], iteration_bounds = array<i64: 1, 1>, scalar_prefetch = 0 : i64, scratch_operands = 0 : i64, tpu.core_type = #tpu.core_type<tc>, window_params = [{transform_indices = @transform_0, window_bounds = array<i64: 16, 4, 5>}, {transform_indices = @transform_1, window_bounds = array<i64: 16, 4>}, {pipeline_mode = #tpu.pipeline_mode<synchronous>, transform_indices = @transform_2, window_bounds = array<i64: 5, 16>}, {transform_indices = @transform_3, window_bounds = array<i64: 16, 16, 16>}]} {
    %c0 = arith.constant 0 : index
    %c0_0 = arith.constant 0 : index
    %0 = vector.load %arg3[%c0, %c0_0] : memref<16x4xbf16, #tpu.memory_space<vmem>>, vector<16x4xbf16>
    %c0_1 = arith.constant 0 : index
    %c0_2 = arith.constant 0 : index
    %1 = vector.load %arg4[%c0_1, %c0_2] : memref<5x16xbf16, #tpu.memory_space<vmem>>, vector<5x16xbf16>
    %c0_3 = arith.constant 0 : index
    %c0_4 = arith.constant 0 : index
    %c0_5 = arith.constant 0 : index
    %2 = vector.load %arg2[%c0_3, %c0_4, %c0_5] : memref<16x4x5xbf16, #tpu.memory_space<vmem>>, vector<1x4x5xbf16>
    %3 = vector.shape_cast %2 : vector<1x4x5xbf16> to vector<4x5xbf16>
    %cst = arith.constant dense<0.000000e+00> : vector<16x5xf32>
    %4 = tpu.matmul %0, %3, %cst {dimension_numbers = #tpu.dot_dimension_numbers<[1], [0], [0], [1], [0, 0, 1, 1], [], []>} : vector<16x4xbf16>, vector<4x5xbf16>, vector<16x5xf32> -> vector<16x5xf32>
    %5 = arith.truncf %4 : vector<16x5xf32> to vector<16x5xbf16>
    %cst_6 = arith.constant dense<0.000000e+00> : vector<16x16xf32>
    %6 = tpu.matmul %5, %1, %cst_6 {dimension_numbers = #tpu.dot_dimension_numbers<[1], [0], [0], [1], [0, 0, 1, 1], [], []>} : vector<16x5xbf16>, vector<5x16xbf16>, vector<16x16xf32> -> vector<16x16xf32>
    %c0_7 = arith.constant 0 : index
    %c0_8 = arith.constant 0 : index
    %c0_9 = arith.constant 0 : index
    %7 = vector.load %arg5[%c0_7, %c0_8, %c0_9] : memref<16x16x16xf32, #tpu.memory_space<vmem>>, vector<1x16x16xf32>
    %8 = vector.shape_cast %7 : vector<1x16x16xf32> to vector<16x16xf32>
    %9 = vector.shape_cast %6 : vector<16x16xf32> to vector<1x16x16xf32>
    tpu.vector_store %arg5[%c0_7, %c0_8, %c0_9], %9 {strides = array<i32>} : memref<16x16x16xf32, #tpu.memory_space<vmem>>, vector<1x16x16xf32>,
    %c1 = arith.constant 1 : index
    %c0_10 = arith.constant 0 : index
    %c0_11 = arith.constant 0 : index
    %10 = vector.load %arg2[%c1, %c0_10, %c0_11] : memref<16x4x5xbf16, #tpu.memory_space<vmem>>, vector<1x4x5xbf16>
    %11 = vector.shape_cast %10 : vector<1x4x5xbf16> to vector<4x5xbf16>
    %cst_12 = arith.constant dense<0.000000e+00> : vector<16x5xf32>
    %12 = tpu.matmul %0, %11, %cst_12 {dimension_numbers = #tpu.dot_dimension_numbers<[1], [0], [0], [1], [0, 0, 1, 1], [], []>} : vector<16x4xbf16>, vector<4x5xbf16>, vector<16x5xf32> -> vector<16x5xf32>
    %13 = arith.truncf %12 : vector<16x5xf32> to vector<16x5xbf16>
    %cst_13 = arith.constant dense<0.000000e+00> : vector<16x16xf32>
    %14 = tpu.matmul %13, %1, %cst_13 {dimension_numbers = #tpu.dot_dimension_numbers<[1], [0], [0], [1], [0, 0, 1, 1], [], []>} : vector<16x5xbf16>, vector<5x16xbf16>, vector<16x16xf32> -> vector<16x16xf32>
    %c1_14 = arith.constant 1 : index
    %c0_15 = arith.constant 0 : index
    %c0_16 = arith.constant 0 : index
    %15 = vector.load %arg5[%c1_14, %c0_15, %c0_16] : memref<16x16x16xf32, #tpu.memory_space<vmem>>, vector<1x16x16xf32>
    %16 = vector.shape_cast %15 : vector<1x16x16xf32> to vector<16x16xf32>
    %17 = vector.shape_cast %14 : vector<16x16xf32> to vector<1x16x16xf32>
    tpu.vector_store %arg5[%c1_14, %c0_15, %c0_16], %17 {strides = array<i32>} : memref<16x16x16xf32, #tpu.memory_space<vmem>>, vector<1x16x16xf32>,
    %c2 = arith.constant 2 : index
    %c0_17 = arith.constant 0 : index
    %c0_18 = arith.constant 0 : index
    %18 = vector.load %arg2[%c2, %c0_17, %c0_18] : memref<16x4x5xbf16, #tpu.memory_space<vmem>>, vector<1x4x5xbf16>
    %19 = vector.shape_cast %18 : vector<1x4x5xbf16> to vector<4x5xbf16>
    %cst_19 = arith.constant dense<0.000000e+00> : vector<16x5xf32>
    %20 = tpu.matmul %0, %19, %cst_19 {dimension_numbers = #tpu.dot_dimension_numbers<[1], [0], [0], [1], [0, 0, 1, 1], [], []>} : vector<16x4xbf16>, vector<4x5xbf16>, vector<16x5xf32> -> vector<16x5xf32>
    %21 = arith.truncf %20 : vector<16x5xf32> to vector<16x5xbf16>
    %cst_20 = arith.constant dense<0.000000e+00> : vector<16x16xf32>
    %22 = tpu.matmul %21, %1, %cst_20 {dimension_numbers = #tpu.dot_dimension_numbers<[1], [0], [0], [1], [0, 0, 1, 1], [], []>} : vector<16x5xbf16>, vector<5x16xbf16>, vector<16x16xf32> -> vector<16x16xf32>
    %c2_21 = arith.constant 2 : index
    %c0_22 = arith.constant 0 : index
    %c0_23 = arith.constant 0 : index
    %23 = vector.load %arg5[%c2_21, %c0_22, %c0_23] : memref<16x16x16xf32, #tpu.memory_space<vmem>>, vector<1x16x16xf32>
    %24 = vector.shape_cast %23 : vector<1x16x16xf32> to vector<16x16xf32>
    %25 = vector.shape_cast %22 : vector<16x16xf32> to vector<1x16x16xf32>
    tpu.vector_store %arg5[%c2_21, %c0_22, %c0_23], %25 {strides = array<i32>} : memref<16x16x16xf32, #tpu.memory_space<vmem>>, vector<1x16x16xf32>,
    %c3 = arith.constant 3 : index
    %c0_24 = arith.constant 0 : index
    %c0_25 = arith.constant 0 : index
    %26 = vector.load %arg2[%c3, %c0_24, %c0_25] : memref<16x4x5xbf16, #tpu.memory_space<vmem>>, vector<1x4x5xbf16>
    %27 = vector.shape_cast %26 : vector<1x4x5xbf16> to vector<4x5xbf16>
    %cst_26 = arith.constant dense<0.000000e+00> : vector<16x5xf32>
    %28 = tpu.matmul %0, %27, %cst_26 {dimension_numbers = #tpu.dot_dimension_numbers<[1], [0], [0], [1], [0, 0, 1, 1], [], []>} : vector<16x4xbf16>, vector<4x5xbf16>, vector<16x5xf32> -> vector<16x5xf32>
    %29 = arith.truncf %28 : vector<16x5xf32> to vector<16x5xbf16>
    %cst_27 = arith.constant dense<0.000000e+00> : vector<16x16xf32>
    %30 = tpu.matmul %29, %1, %cst_27 {dimension_numbers = #tpu.dot_dimension_numbers<[1], [0], [0], [1], [0, 0, 1, 1], [], []>} : vector<16x5xbf16>, vector<5x16xbf16>, vector<16x16xf32> -> vector<16x16xf32>
    %c3_28 = arith.constant 3 : index
    %c0_29 = arith.constant 0 : index
    %c0_30 = arith.constant 0 : index
    %31 = vector.load %arg5[%c3_28, %c0_29, %c0_30] : memref<16x16x16xf32, #tpu.memory_space<vmem>>, vector<1x16x16xf32>
    %32 = vector.shape_cast %31 : vector<1x16x16xf32> to vector<16x16xf32>
    %33 = vector.shape_cast %30 : vector<16x16xf32> to vector<1x16x16xf32>
    tpu.vector_store %arg5[%c3_28, %c0_29, %c0_30], %33 {strides = array<i32>} : memref<16x16x16xf32, #tpu.memory_space<vmem>>, vector<1x16x16xf32>,
    %c4 = arith.constant 4 : index
    %c0_31 = arith.constant 0 : index
    %c0_32 = arith.constant 0 : index
    %34 = vector.load %arg2[%c4, %c0_31, %c0_32] : memref<16x4x5xbf16, #tpu.memory_space<vmem>>, vector<1x4x5xbf16>
    %35 = vector.shape_cast %34 : vector<1x4x5xbf16> to vector<4x5xbf16>
    %cst_33 = arith.constant dense<0.000000e+00> : vector<16x5xf32>
    %36 = tpu.matmul %0, %35, %cst_33 {dimension_numbers = #tpu.dot_dimension_numbers<[1], [0], [0], [1], [0, 0, 1, 1], [], []>} : vector<16x4xbf16>, vector<4x5xbf16>, vector<16x5xf32> -> vector<16x5xf32>
    %37 = arith.truncf %36 : vector<16x5xf32> to vector<16x5xbf16>
    %cst_34 = arith.constant dense<0.000000e+00> : vector<16x16xf32>
    %38 = tpu.matmul %37, %1, %cst_34 {dimension_numbers = #tpu.dot_dimension_numbers<[1], [0], [0], [1], [0, 0, 1, 1], [], []>} : vector<16x5xbf16>, vector<5x16xbf16>, vector<16x16xf32> -> vector<16x16xf32>
    %c4_35 = arith.constant 4 : index
    %c0_36 = arith.constant 0 : index
    %c0_37 = arith.constant 0 : index
    %39 = vector.load %arg5[%c4_35, %c0_36, %c0_37] : memref<16x16x16xf32, #tpu.memory_space<vmem>>, vector<1x16x16xf32>
    %40 = vector.shape_cast %39 : vector<1x16x16xf32> to vector<16x16xf32>
    %41 = vector.shape_cast %38 : vector<16x16xf32> to vector<1x16x16xf32>
    tpu.vector_store %arg5[%c4_35, %c0_36, %c0_37], %41 {strides = array<i32>} : memref<16x16x16xf32, #tpu.memory_space<vmem>>, vector<1x16x16xf32>,
    %c5 = arith.constant 5 : index
    %c0_38 = arith.constant 0 : index
    %c0_39 = arith.constant 0 : index
    %42 = vector.load %arg2[%c5, %c0_38, %c0_39] : memref<16x4x5xbf16, #tpu.memory_space<vmem>>, vector<1x4x5xbf16>
    %43 = vector.shape_cast %42 : vector<1x4x5xbf16> to vector<4x5xbf16>
    %cst_40 = arith.constant dense<0.000000e+00> : vector<16x5xf32>
    %44 = tpu.matmul %0, %43, %cst_40 {dimension_numbers = #tpu.dot_dimension_numbers<[1], [0], [0], [1], [0, 0, 1, 1], [], []>} : vector<16x4xbf16>, vector<4x5xbf16>, vector<16x5xf32> -> vector<16x5xf32>
    %45 = arith.truncf %44 : vector<16x5xf32> to vector<16x5xbf16>
    %cst_41 = arith.constant dense<0.000000e+00> : vector<16x16xf32>
    %46 = tpu.matmul %45, %1, %cst_41 {dimension_numbers = #tpu.dot_dimension_numbers<[1], [0], [0], [1], [0, 0, 1, 1], [], []>} : vector<16x5xbf16>, vector<5x16xbf16>, vector<16x16xf32> -> vector<16x16xf32>
    %c5_42 = arith.constant 5 : index
    %c0_43 = arith.constant 0 : index
    %c0_44 = arith.constant 0 : index
    %47 = vector.load %arg5[%c5_42, %c0_43, %c0_44] : memref<16x16x16xf32, #tpu.memory_space<vmem>>, vector<1x16x16xf32>
    %48 = vector.shape_cast %47 : vector<1x16x16xf32> to vector<16x16xf32>
    %49 = vector.shape_cast %46 : vector<16x16xf32> to vector<1x16x16xf32>
    tpu.vector_store %arg5[%c5_42, %c0_43, %c0_44], %49 {strides = array<i32>} : memref<16x16x16xf32, #tpu.memory_space<vmem>>, vector<1x16x16xf32>,
    %c6 = arith.constant 6 : index
    %c0_45 = arith.constant 0 : index
    %c0_46 = arith.constant 0 : index
    %50 = vector.load %arg2[%c6, %c0_45, %c0_46] : memref<16x4x5xbf16, #tpu.memory_space<vmem>>, vector<1x4x5xbf16>
    %51 = vector.shape_cast %50 : vector<1x4x5xbf16> to vector<4x5xbf16>
    %cst_47 = arith.constant dense<0.000000e+00> : vector<16x5xf32>
    %52 = tpu.matmul %0, %51, %cst_47 {dimension_numbers = #tpu.dot_dimension_numbers<[1], [0], [0], [1], [0, 0, 1, 1], [], []>} : vector<16x4xbf16>, vector<4x5xbf16>, vector<16x5xf32> -> vector<16x5xf32>
    %53 = arith.truncf %52 : vector<16x5xf32> to vector<16x5xbf16>
    %cst_48 = arith.constant dense<0.000000e+00> : vector<16x16xf32>
    %54 = tpu.matmul %53, %1, %cst_48 {dimension_numbers = #tpu.dot_dimension_numbers<[1], [0], [0], [1], [0, 0, 1, 1], [], []>} : vector<16x5xbf16>, vector<5x16xbf16>, vector<16x16xf32> -> vector<16x16xf32>
    %c6_49 = arith.constant 6 : index
    %c0_50 = arith.constant 0 : index
    %c0_51 = arith.constant 0 : index
    %55 = vector.load %arg5[%c6_49, %c0_50, %c0_51] : memref<16x16x16xf32, #tpu.memory_space<vmem>>, vector<1x16x16xf32>
    %56 = vector.shape_cast %55 : vector<1x16x16xf32> to vector<16x16xf32>
    %57 = vector.shape_cast %54 : vector<16x16xf32> to vector<1x16x16xf32>
    tpu.vector_store %arg5[%c6_49, %c0_50, %c0_51], %57 {strides = array<i32>} : memref<16x16x16xf32, #tpu.memory_space<vmem>>, vector<1x16x16xf32>,
    %c7 = arith.constant 7 : index
    %c0_52 = arith.constant 0 : index
    %c0_53 = arith.constant 0 : index
    %58 = vector.load %arg2[%c7, %c0_52, %c0_53] : memref<16x4x5xbf16, #tpu.memory_space<vmem>>, vector<1x4x5xbf16>
    %59 = vector.shape_cast %58 : vector<1x4x5xbf16> to vector<4x5xbf16>
    %cst_54 = arith.constant dense<0.000000e+00> : vector<16x5xf32>
    %60 = tpu.matmul %0, %59, %cst_54 {dimension_numbers = #tpu.dot_dimension_numbers<[1], [0], [0], [1], [0, 0, 1, 1], [], []>} : vector<16x4xbf16>, vector<4x5xbf16>, vector<16x5xf32> -> vector<16x5xf32>
    %61 = arith.truncf %60 : vector<16x5xf32> to vector<16x5xbf16>
    %cst_55 = arith.constant dense<0.000000e+00> : vector<16x16xf32>
    %62 = tpu.matmul %61, %1, %cst_55 {dimension_numbers = #tpu.dot_dimension_numbers<[1], [0], [0], [1], [0, 0, 1, 1], [], []>} : vector<16x5xbf16>, vector<5x16xbf16>, vector<16x16xf32> -> vector<16x16xf32>
    %c7_56 = arith.constant 7 : index
    %c0_57 = arith.constant 0 : index
    %c0_58 = arith.constant 0 : index
    %63 = vector.load %arg5[%c7_56, %c0_57, %c0_58] : memref<16x16x16xf32, #tpu.memory_space<vmem>>, vector<1x16x16xf32>
    %64 = vector.shape_cast %63 : vector<1x16x16xf32> to vector<16x16xf32>
    %65 = vector.shape_cast %62 : vector<16x16xf32> to vector<1x16x16xf32>
    tpu.vector_store %arg5[%c7_56, %c0_57, %c0_58], %65 {strides = array<i32>} : memref<16x16x16xf32, #tpu.memory_space<vmem>>, vector<1x16x16xf32>,
    %c8 = arith.constant 8 : index
    %c0_59 = arith.constant 0 : index
    %c0_60 = arith.constant 0 : index
    %66 = vector.load %arg2[%c8, %c0_59, %c0_60] : memref<16x4x5xbf16, #tpu.memory_space<vmem>>, vector<1x4x5xbf16>
    %67 = vector.shape_cast %66 : vector<1x4x5xbf16> to vector<4x5xbf16>
    %cst_61 = arith.constant dense<0.000000e+00> : vector<16x5xf32>
    %68 = tpu.matmul %0, %67, %cst_61 {dimension_numbers = #tpu.dot_dimension_numbers<[1], [0], [0], [1], [0, 0, 1, 1], [], []>} : vector<16x4xbf16>, vector<4x5xbf16>, vector<16x5xf32> -> vector<16x5xf32>
    %69 = arith.truncf %68 : vector<16x5xf32> to vector<16x5xbf16>
    %cst_62 = arith.constant dense<0.000000e+00> : vector<16x16xf32>
    %70 = tpu.matmul %69, %1, %cst_62 {dimension_numbers = #tpu.dot_dimension_numbers<[1], [0], [0], [1], [0, 0, 1, 1], [], []>} : vector<16x5xbf16>, vector<5x16xbf16>, vector<16x16xf32> -> vector<16x16xf32>
    %c8_63 = arith.constant 8 : index
    %c0_64 = arith.constant 0 : index
    %c0_65 = arith.constant 0 : index
    %71 = vector.load %arg5[%c8_63, %c0_64, %c0_65] : memref<16x16x16xf32, #tpu.memory_space<vmem>>, vector<1x16x16xf32>
    %72 = vector.shape_cast %71 : vector<1x16x16xf32> to vector<16x16xf32>
    %73 = vector.shape_cast %70 : vector<16x16xf32> to vector<1x16x16xf32>
    tpu.vector_store %arg5[%c8_63, %c0_64, %c0_65], %73 {strides = array<i32>} : memref<16x16x16xf32, #tpu.memory_space<vmem>>, vector<1x16x16xf32>,
    %c9 = arith.constant 9 : index
    %c0_66 = arith.constant 0 : index
    %c0_67 = arith.constant 0 : index
    %74 = vector.load %arg2[%c9, %c0_66, %c0_67] : memref<16x4x5xbf16, #tpu.memory_space<vmem>>, vector<1x4x5xbf16>
    %75 = vector.shape_cast %74 : vector<1x4x5xbf16> to vector<4x5xbf16>
    %cst_68 = arith.constant dense<0.000000e+00> : vector<16x5xf32>
    %76 = tpu.matmul %0, %75, %cst_68 {dimension_numbers = #tpu.dot_dimension_numbers<[1], [0], [0], [1], [0, 0, 1, 1], [], []>} : vector<16x4xbf16>, vector<4x5xbf16>, vector<16x5xf32> -> vector<16x5xf32>
    %77 = arith.truncf %76 : vector<16x5xf32> to vector<16x5xbf16>
    %cst_69 = arith.constant dense<0.000000e+00> : vector<16x16xf32>
    %78 = tpu.matmul %77, %1, %cst_69 {dimension_numbers = #tpu.dot_dimension_numbers<[1], [0], [0], [1], [0, 0, 1, 1], [], []>} : vector<16x5xbf16>, vector<5x16xbf16>, vector<16x16xf32> -> vector<16x16xf32>
    %c9_70 = arith.constant 9 : index
    %c0_71 = arith.constant 0 : index
    %c0_72 = arith.constant 0 : index
    %79 = vector.load %arg5[%c9_70, %c0_71, %c0_72] : memref<16x16x16xf32, #tpu.memory_space<vmem>>, vector<1x16x16xf32>
    %80 = vector.shape_cast %79 : vector<1x16x16xf32> to vector<16x16xf32>
    %81 = vector.shape_cast %78 : vector<16x16xf32> to vector<1x16x16xf32>
    tpu.vector_store %arg5[%c9_70, %c0_71, %c0_72], %81 {strides = array<i32>} : memref<16x16x16xf32, #tpu.memory_space<vmem>>, vector<1x16x16xf32>,
    %c10 = arith.constant 10 : index
    %c0_73 = arith.constant 0 : index
    %c0_74 = arith.constant 0 : index
    %82 = vector.load %arg2[%c10, %c0_73, %c0_74] : memref<16x4x5xbf16, #tpu.memory_space<vmem>>, vector<1x4x5xbf16>
    %83 = vector.shape_cast %82 : vector<1x4x5xbf16> to vector<4x5xbf16>
    %cst_75 = arith.constant dense<0.000000e+00> : vector<16x5xf32>
    %84 = tpu.matmul %0, %83, %cst_75 {dimension_numbers = #tpu.dot_dimension_numbers<[1], [0], [0], [1], [0, 0, 1, 1], [], []>} : vector<16x4xbf16>, vector<4x5xbf16>, vector<16x5xf32> -> vector<16x5xf32>
    %85 = arith.truncf %84 : vector<16x5xf32> to vector<16x5xbf16>
    %cst_76 = arith.constant dense<0.000000e+00> : vector<16x16xf32>
    %86 = tpu.matmul %85, %1, %cst_76 {dimension_numbers = #tpu.dot_dimension_numbers<[1], [0], [0], [1], [0, 0, 1, 1], [], []>} : vector<16x5xbf16>, vector<5x16xbf16>, vector<16x16xf32> -> vector<16x16xf32>
    %c10_77 = arith.constant 10 : index
    %c0_78 = arith.constant 0 : index
    %c0_79 = arith.constant 0 : index
    %87 = vector.load %arg5[%c10_77, %c0_78, %c0_79] : memref<16x16x16xf32, #tpu.memory_space<vmem>>, vector<1x16x16xf32>
    %88 = vector.shape_cast %87 : vector<1x16x16xf32> to vector<16x16xf32>
    %89 = vector.shape_cast %86 : vector<16x16xf32> to vector<1x16x16xf32>
    tpu.vector_store %arg5[%c10_77, %c0_78, %c0_79], %89 {strides = array<i32>} : memref<16x16x16xf32, #tpu.memory_space<vmem>>, vector<1x16x16xf32>,
    %c11 = arith.constant 11 : index
    %c0_80 = arith.constant 0 : index
    %c0_81 = arith.constant 0 : index
    %90 = vector.load %arg2[%c11, %c0_80, %c0_81] : memref<16x4x5xbf16, #tpu.memory_space<vmem>>, vector<1x4x5xbf16>
    %91 = vector.shape_cast %90 : vector<1x4x5xbf16> to vector<4x5xbf16>
    %cst_82 = arith.constant dense<0.000000e+00> : vector<16x5xf32>
    %92 = tpu.matmul %0, %91, %cst_82 {dimension_numbers = #tpu.dot_dimension_numbers<[1], [0], [0], [1], [0, 0, 1, 1], [], []>} : vector<16x4xbf16>, vector<4x5xbf16>, vector<16x5xf32> -> vector<16x5xf32>
    %93 = arith.truncf %92 : vector<16x5xf32> to vector<16x5xbf16>
    %cst_83 = arith.constant dense<0.000000e+00> : vector<16x16xf32>
    %94 = tpu.matmul %93, %1, %cst_83 {dimension_numbers = #tpu.dot_dimension_numbers<[1], [0], [0], [1], [0, 0, 1, 1], [], []>} : vector<16x5xbf16>, vector<5x16xbf16>, vector<16x16xf32> -> vector<16x16xf32>
    %c11_84 = arith.constant 11 : index
    %c0_85 = arith.constant 0 : index
    %c0_86 = arith.constant 0 : index
    %95 = vector.load %arg5[%c11_84, %c0_85, %c0_86] : memref<16x16x16xf32, #tpu.memory_space<vmem>>, vector<1x16x16xf32>
    %96 = vector.shape_cast %95 : vector<1x16x16xf32> to vector<16x16xf32>
    %97 = vector.shape_cast %94 : vector<16x16xf32> to vector<1x16x16xf32>
    tpu.vector_store %arg5[%c11_84, %c0_85, %c0_86], %97 {strides = array<i32>} : memref<16x16x16xf32, #tpu.memory_space<vmem>>, vector<1x16x16xf32>,
    %c12 = arith.constant 12 : index
    %c0_87 = arith.constant 0 : index
    %c0_88 = arith.constant 0 : index
    %98 = vector.load %arg2[%c12, %c0_87, %c0_88] : memref<16x4x5xbf16, #tpu.memory_space<vmem>>, vector<1x4x5xbf16>
    %99 = vector.shape_cast %98 : vector<1x4x5xbf16> to vector<4x5xbf16>
    %cst_89 = arith.constant dense<0.000000e+00> : vector<16x5xf32>
    %100 = tpu.matmul %0, %99, %cst_89 {dimension_numbers = #tpu.dot_dimension_numbers<[1], [0], [0], [1], [0, 0, 1, 1], [], []>} : vector<16x4xbf16>, vector<4x5xbf16>, vector<16x5xf32> -> vector<16x5xf32>
    %101 = arith.truncf %100 : vector<16x5xf32> to vector<16x5xbf16>
    %cst_90 = arith.constant dense<0.000000e+00> : vector<16x16xf32>
    %102 = tpu.matmul %101, %1, %cst_90 {dimension_numbers = #tpu.dot_dimension_numbers<[1], [0], [0], [1], [0, 0, 1, 1], [], []>} : vector<16x5xbf16>, vector<5x16xbf16>, vector<16x16xf32> -> vector<16x16xf32>
    %c12_91 = arith.constant 12 : index
    %c0_92 = arith.constant 0 : index
    %c0_93 = arith.constant 0 : index
    %103 = vector.load %arg5[%c12_91, %c0_92, %c0_93] : memref<16x16x16xf32, #tpu.memory_space<vmem>>, vector<1x16x16xf32>
    %104 = vector.shape_cast %103 : vector<1x16x16xf32> to vector<16x16xf32>
    %105 = vector.shape_cast %102 : vector<16x16xf32> to vector<1x16x16xf32>
    tpu.vector_store %arg5[%c12_91, %c0_92, %c0_93], %105 {strides = array<i32>} : memref<16x16x16xf32, #tpu.memory_space<vmem>>, vector<1x16x16xf32>,
    %c13 = arith.constant 13 : index
    %c0_94 = arith.constant 0 : index
    %c0_95 = arith.constant 0 : index
    %106 = vector.load %arg2[%c13, %c0_94, %c0_95] : memref<16x4x5xbf16, #tpu.memory_space<vmem>>, vector<1x4x5xbf16>
    %107 = vector.shape_cast %106 : vector<1x4x5xbf16> to vector<4x5xbf16>
    %cst_96 = arith.constant dense<0.000000e+00> : vector<16x5xf32>
    %108 = tpu.matmul %0, %107, %cst_96 {dimension_numbers = #tpu.dot_dimension_numbers<[1], [0], [0], [1], [0, 0, 1, 1], [], []>} : vector<16x4xbf16>, vector<4x5xbf16>, vector<16x5xf32> -> vector<16x5xf32>
    %109 = arith.truncf %108 : vector<16x5xf32> to vector<16x5xbf16>
    %cst_97 = arith.constant dense<0.000000e+00> : vector<16x16xf32>
    %110 = tpu.matmul %109, %1, %cst_97 {dimension_numbers = #tpu.dot_dimension_numbers<[1], [0], [0], [1], [0, 0, 1, 1], [], []>} : vector<16x5xbf16>, vector<5x16xbf16>, vector<16x16xf32> -> vector<16x16xf32>
    %c13_98 = arith.constant 13 : index
    %c0_99 = arith.constant 0 : index
    %c0_100 = arith.constant 0 : index
    %111 = vector.load %arg5[%c13_98, %c0_99, %c0_100] : memref<16x16x16xf32, #tpu.memory_space<vmem>>, vector<1x16x16xf32>
    %112 = vector.shape_cast %111 : vector<1x16x16xf32> to vector<16x16xf32>
    %113 = vector.shape_cast %110 : vector<16x16xf32> to vector<1x16x16xf32>
    tpu.vector_store %arg5[%c13_98, %c0_99, %c0_100], %113 {strides = array<i32>} : memref<16x16x16xf32, #tpu.memory_space<vmem>>, vector<1x16x16xf32>,
    %c14 = arith.constant 14 : index
    %c0_101 = arith.constant 0 : index
    %c0_102 = arith.constant 0 : index
    %114 = vector.load %arg2[%c14, %c0_101, %c0_102] : memref<16x4x5xbf16, #tpu.memory_space<vmem>>, vector<1x4x5xbf16>
    %115 = vector.shape_cast %114 : vector<1x4x5xbf16> to vector<4x5xbf16>
    %cst_103 = arith.constant dense<0.000000e+00> : vector<16x5xf32>
    %116 = tpu.matmul %0, %115, %cst_103 {dimension_numbers = #tpu.dot_dimension_numbers<[1], [0], [0], [1], [0, 0, 1, 1], [], []>} : vector<16x4xbf16>, vector<4x5xbf16>, vector<16x5xf32> -> vector<16x5xf32>
    %117 = arith.truncf %116 : vector<16x5xf32> to vector<16x5xbf16>
    %cst_104 = arith.constant dense<0.000000e+00> : vector<16x16xf32>
    %118 = tpu.matmul %117, %1, %cst_104 {dimension_numbers = #tpu.dot_dimension_numbers<[1], [0], [0], [1], [0, 0, 1, 1], [], []>} : vector<16x5xbf16>, vector<5x16xbf16>, vector<16x16xf32> -> vector<16x16xf32>
    %c14_105 = arith.constant 14 : index
    %c0_106 = arith.constant 0 : index
    %c0_107 = arith.constant 0 : index
    %119 = vector.load %arg5[%c14_105, %c0_106, %c0_107] : memref<16x16x16xf32, #tpu.memory_space<vmem>>, vector<1x16x16xf32>
    %120 = vector.shape_cast %119 : vector<1x16x16xf32> to vector<16x16xf32>
    %121 = vector.shape_cast %118 : vector<16x16xf32> to vector<1x16x16xf32>
    tpu.vector_store %arg5[%c14_105, %c0_106, %c0_107], %121 {strides = array<i32>} : memref<16x16x16xf32, #tpu.memory_space<vmem>>, vector<1x16x16xf32>,
    %c15 = arith.constant 15 : index
    %c0_108 = arith.constant 0 : index
    %c0_109 = arith.constant 0 : index
    %122 = vector.load %arg2[%c15, %c0_108, %c0_109] : memref<16x4x5xbf16, #tpu.memory_space<vmem>>, vector<1x4x5xbf16>
    %123 = vector.shape_cast %122 : vector<1x4x5xbf16> to vector<4x5xbf16>
    %cst_110 = arith.constant dense<0.000000e+00> : vector<16x5xf32>
    %124 = tpu.matmul %0, %123, %cst_110 {dimension_numbers = #tpu.dot_dimension_numbers<[1], [0], [0], [1], [0, 0, 1, 1], [], []>} : vector<16x4xbf16>, vector<4x5xbf16>, vector<16x5xf32> -> vector<16x5xf32>
    %125 = arith.truncf %124 : vector<16x5xf32> to vector<16x5xbf16>
    %cst_111 = arith.constant dense<0.000000e+00> : vector<16x16xf32>
    %126 = tpu.matmul %125, %1, %cst_111 {dimension_numbers = #tpu.dot_dimension_numbers<[1], [0], [0], [1], [0, 0, 1, 1], [], []>} : vector<16x5xbf16>, vector<5x16xbf16>, vector<16x16xf32> -> vector<16x16xf32>
    %c15_112 = arith.constant 15 : index
    %c0_113 = arith.constant 0 : index
    %c0_114 = arith.constant 0 : index
    %127 = vector.load %arg5[%c15_112, %c0_113, %c0_114] : memref<16x16x16xf32, #tpu.memory_space<vmem>>, vector<1x16x16xf32>
    %128 = vector.shape_cast %127 : vector<1x16x16xf32> to vector<16x16xf32>
    %129 = vector.shape_cast %126 : vector<16x16xf32> to vector<1x16x16xf32>
    tpu.vector_store %arg5[%c15_112, %c0_113, %c0_114], %129 {strides = array<i32>} : memref<16x16x16xf32, #tpu.memory_space<vmem>>, vector<1x16x16xf32>,
    return
  }
  func.func @transform_0(%arg0: i32, %arg1: i32) -> (i32, i32, i32) {
    %c0_i32 = arith.constant 0 : i32
    %c0_i32_0 = arith.constant 0 : i32
    %c0_i32_1 = arith.constant 0 : i32
    return %arg0, %c0_i32, %c0_i32_0 : i32, i32, i32
  }
  func.func @transform_1(%arg0: i32, %arg1: i32) -> (i32, i32) {
    %c0_i32 = arith.constant 0 : i32
    %c0_i32_0 = arith.constant 0 : i32
    return %arg1, %c0_i32 : i32, i32
  }
  func.func @transform_2(%arg0: i32, %arg1: i32) -> (i32, i32) {
    %c0_i32 = arith.constant 0 : i32
    %c0_i32_0 = arith.constant 0 : i32
    %c0_i32_1 = arith.constant 0 : i32
    return %c0_i32, %c0_i32_0 : i32, i32
  }
  func.func @transform_3(%arg0: i32, %arg1: i32) -> (i32, i32, i32) {
    %c0_i32 = arith.constant 0 : i32
    %c0_i32_0 = arith.constant 0 : i32
    return %arg0, %arg1, %c0_i32 : i32, i32, i32
  }
}

</mosaic_0001>

<bundles_post_ra>
// kernel: mynet_forward.3
= control target key start
LH: loop header
LB: loop body
LE: loop exit
PB: predicated region body
PF: predicated region fallthrough
CT: control target
= control target key end

     0   :  { %s732_s18 = smov 0   ;;  %s734_s19 = smov 0   ;;  %s805_s0 = inlined_call_operand.vmem [shape: bf16[2,64,27], index: 0, kind: input, shape index: {}]   ;;  %s806_s1 = inlined_call_operand.vmem [shape: bf16[27,64], index: 1, kind: input, shape index: {}]   ;;  %s807_s2 = inlined_call_operand.vmem [shape: f32[1,64], index: 2, kind: input, shape index: {}]   ;;  %s808_s3 = inlined_call_operand.vmem [shape: f32[1,64], index: 3, kind: input, shape index: {}]   ;;  %s809_s4 = inlined_call_operand.vmem [shape: f32[1,64], index: 4, kind: input, shape index: {}]   ;;  %s810_s5 = inlined_call_operand.vmem [shape: bf16[2,64,64], index: 5, kind: output, shape index: {}]  }
   0x1   :  { %s736_s20 = smov 0  }
   0x2 LB: > { %s27_s21 = sadd.s32 1, %s695_s19  ;;  %p586_p0 = scmp.ge.s32.totalorder %s699_s20, 1  ;;  %s699_s20 = sphi %s736_s20, %s15_s20   ;;  %s695_s19 = sphi %s734_s19, %s812_s19   ;;  %s691_s18 = sphi %s732_s18, %s811_s18  }
   0x3   : > { %p29_p1 = scmp.ge.s32.totalorder %s27_s21, 2  ;;  %p208_p2 = scmp.lt.s32.totalorder %s699_s20, 3 }
   0x5   : > { %s814_s21 = smov (%p29_p1, %s27_s21), 0  ;;  %p209_p3 = pnand %p586_p0, %p208_p2 }
   0x6   : > { %v671_v0 = vld [vmem:[%s806_s1] sm:$0xff] (!%p209_p3)   ;;  %vm321_vm0 = vcmask (!%p209_p3), 1044480   ;;  %v672_v1 = vld [vmem:[%s806_s1 + $0x8] sm:$0x3f] (!%p209_p3)   ;;  %vm322_vm1 = vcmask (!%p209_p3), 1045504   ;;  %p245_p4 = scmp.lt.s32.totalorder (!%p209_p3), %s691_s18, 1 }
   0x7   : > { %212 = sbr.rel (%p209_p3) target bundleno = 249 (0xf9), region = 40  ;;  %630 = vmatprep.subr.bf16.mxu0 (!%p209_p3), %v671_v0  ;;  %642 = vmatprep.subr.bf16.mxu1 (!%p209_p3), %v671_v0  ;;  %v701_v2 = vmov (!%p209_p3), 65535   ;;  %vm308_vm2 = vcmask (!%p209_p3), 220160   ;;  %v601_v10 = vld [vmem:[%s807_s2] ss:$0 sm:$0xff] (!%p209_p3)  ;;  %vm486_vm3 = vcmask (!%p209_p3), 519168  }
   0x8   : > { %631 = vmatpush3.bf16.msra.mxu0 (!%p209_p3), %v671_v0  ;;  %644 = vmatpush3.bf16.msra.mxu1 (!%p209_p3), %v671_v0  ;;  %v323_v3 = vsel (!%p209_p3), %vm321_vm0, 4294967295, %v701_v2  ;;  %v602_v12 = vld [vmem:[%s808_s3] ss:$0 sm:$0xff] (!%p209_p3) }
   0x9   : > { %v324_v4 = vsel (!%p209_p3), %vm322_vm1, %v323_v3, 0  ;;  %v603_v16 = vld [vmem:[%s809_s4] ss:$0 sm:$0xff] (!%p209_p3) }
   0xa   : > { %v326_v5 = vand.u32 (!%p209_p3), %v672_v1, %v324_v4 }
   0xc   : > { %632 = vmatprep.subr.bf16.mxu0 (!%p209_p3), %v326_v5  ;;  %643 = vmatprep.subr.bf16.mxu1 (!%p209_p3), %v326_v5 }
   0xd   : > { %633 = vmatpush3.bf16.msra.mxu0 (!%p209_p3), %v326_v5  ;;  %645 = vmatpush3.bf16.msra.mxu1 (!%p209_p3), %v326_v5 }
   0xe   : > { %s816_s18 = smov (!%p245_p4, %s691_s18), 1 }
   0xf   : > { %s614_s26 = sshll.u32 %s816_s18, 5 }
  0x10   : > { %s252_s29 = scalar_lea.vmem %s805_s0, %s614_s26  ;;  %s778_s13 = scalar_lea.vmem %s810_s5, %s614_s26 }
  0x11   : > { %v673_v6 = vld [vmem:[%s252_s29] sm:$0xff]   ;;  %v674_v7 = vld [vmem:[%s252_s29 + $0x10] sm:$0xff]   ;;  %v675_v8 = vld [vmem:[%s252_s29 + $0x8] sm:$0xff]  }
  0x12   : > { %634 = vmatprep.mubr.msk.bf16.mxu0 %vm308_vm2, %v673_v6  ;;  %638 = vmatprep.mubr.msk.bf16.mxu1 %vm308_vm2, %v674_v7  ;;  %v676_v9 = vld [vmem:[%s252_s29 + $0x18] sm:$0xff]  }
  0x13   : > { %635 = vmatmul.mubr.msk.bf16.vlgmr.msra.gmra.mrb[0].mxu0 %vm308_vm2, %v675_v8  ;;  %639 = vmatmul.mubr.msk.bf16.vlgmr.msra.gmra.mrb[0].mxu1 %vm308_vm2, %v676_v9 }
  0xe6   : > { %v636_v11 = vpop.f32.mrb[0].mxu0  ;;  %v640_v14 = vpop.f32.mrb[0].mxu1 }
  0xe7   : > { %v402_v13 = vmul.f32 %v636_v11, %v601_v10  ;;  %v362_v15 = vpop.f32.mrb[1].mxu0  ;;  %v406_v17 = vmul.f32 %v640_v14, %v601_v10  ;;  %v378_v19 = vpop.f32.mrb[1].mxu1 }
  0xe8   : > { %v400_v18 = vmul.f32 %v601_v10, %v362_v15  ;;  %v637_v20 = vpop.f32.mrb[2].mxu0  ;;  %v404_v22 = vmul.f32 %v601_v10, %v378_v19  ;;  %v641_v24 = vpop.f32.mrb[2].mxu1 }
  0xe9   : > { %v417_v21 = vadd.f32 %v602_v12, %v402_v13  ;;  %v403_v23 = vmul.f32 %v637_v20, %v601_v10  ;;  %v365_v25 = vpop.f32.mrb[3].mxu0  ;;  %v421_v26 = vadd.f32 %v602_v12, %v406_v17  ;;  %v407_v28 = vmul.f32 %v641_v24, %v601_v10  ;;  %v381_v30 = vpop.f32.mrb[3].mxu1 }
  0xea   : > { %v415_v27 = vadd.f32 %v602_v12, %v400_v18  ;;  %v401_v29 = vmul.f32 %v601_v10, %v365_v25  ;;  %v419_v32 = vadd.f32 %v602_v12, %v404_v22  ;;  %v405_v49 = vmul.f32 %v601_v10, %v381_v30 }
  0xeb   : > { %vm425_vm4 = vcmp.ge.f32.partialorder %v417_v21, 0.0  ;;  %v440_v31 = vmul.f32 %v603_v16, %v417_v21  ;;  %v418_v33 = vadd.f32 %v602_v12, %v403_v23  ;;  %vm429_vm5 = vcmp.ge.f32.partialorder %v421_v26, 0.0 }
  0xec   : > { %v444_v34 = vmul.f32 %v603_v16, %v421_v26  ;;  %vm423_vm6 = vcmp.ge.f32.partialorder %v415_v27, 0.0  ;;  %v438_v35 = vmul.f32 %v603_v16, %v415_v27  ;;  %vm427_vm7 = vcmp.ge.f32.partialorder %v419_v32, 0.0 }
  0xed   : > { %v448_v36 = vsel %vm425_vm4, %v417_v21, %v440_v31  ;;  %v442_v37 = vmul.f32 %v603_v16, %v419_v32  ;;  %vm426_vm8 = vcmp.ge.f32.partialorder %v418_v33, 0.0  ;;  %v441_v41 = vmul.f32 %v603_v16, %v418_v33 }
  0xee   : > { %v618_v38 = vpack.c.bf16 %v448_v36, %v448_v36  ;;  %v452_v39 = vsel %vm429_vm5, %v421_v26, %v444_v34  ;;  %v446_v40 = vsel %vm423_vm6, %v415_v27, %v438_v35  ;;  %v422_v45 = vadd.f32 %v602_v12, %v407_v28 }
  0xef   : > { %v622_v42 = vpack.c.bf16 %v452_v39, %v452_v39  ;;  %v616_v43 = vpack.c.bf16 %v446_v40, %v446_v40  ;;  %v450_v44 = vsel %vm427_vm7, %v419_v32, %v442_v37  ;;  %v449_v47 = vsel %vm426_vm8, %v418_v33, %v441_v41 }
  0xf0   : > { %489 = vst.msk [vmem:[%s778_s13 + $0x8] sm:$0xf] %vm486_vm3, %v618_v38  ;;  %v620_v46 = vpack.c.bf16 %v450_v44, %v450_v44  ;;  %v416_v48 = vadd.f32 %v602_v12, %v401_v29  ;;  %v619_v50 = vpack.c.bf16 %v449_v47, %v449_v47  ;;  %vm430_vm9 = vcmp.ge.f32.partialorder %v422_v45, 0.0 }
  0xf1   : > { %493 = vst.msk [vmem:[%s778_s13 + $0x18] sm:$0xf] %vm486_vm3, %v622_v42  ;;  %487 = vst.msk [vmem:[%s778_s13] sm:$0xf] %vm486_vm3, %v616_v43  ;;  %v445_v51 = vmul.f32 %v603_v16, %v422_v45  ;;  %v420_v53 = vadd.f32 %v602_v12, %v405_v49 }
  0xf2   : > { %491 = vst.msk [vmem:[%s778_s13 + $0x10] sm:$0xf] %vm486_vm3, %v620_v46  ;;  %vm424_vm10 = vcmp.ge.f32.partialorder %v416_v48, 0.0  ;;  %v439_v52 = vmul.f32 %v603_v16, %v416_v48  ;;  %490 = vst.msk [vmem:[%s778_s13 + $0xc] sm:$0xf] %vm486_vm3, %v619_v50 }
  0xf3   : > { %v453_v54 = vsel %vm430_vm9, %v422_v45, %v445_v51  ;;  %vm428_vm11 = vcmp.ge.f32.partialorder %v420_v53, 0.0  ;;  %v443_v57 = vmul.f32 %v603_v16, %v420_v53 }
  0xf4   : > { %v623_v55 = vpack.c.bf16 %v453_v54, %v453_v54  ;;  %v447_v56 = vsel %vm424_vm10, %v416_v48, %v439_v52 }
  0xf5   : > { %v617_v58 = vpack.c.bf16 %v447_v56, %v447_v56  ;;  %v451_v59 = vsel %vm428_vm11, %v420_v53, %v443_v57 }
  0xf6   : > { %494 = vst.msk [vmem:[%s778_s13 + $0x1c] sm:$0xf] %vm486_vm3, %v623_v55  ;;  %v621_v60 = vpack.c.bf16 %v451_v59, %v451_v59 }
  0xf7   : > { %488 = vst.msk [vmem:[%s778_s13 + $0x4] sm:$0xf] %vm486_vm3, %v617_v58 }
  0xf8   : > { %492 = vst.msk [vmem:[%s778_s13 + $0x14] sm:$0xf] %vm486_vm3, %v621_v60 }
  0xf9 PF: > { %s15_s20 = sadd.s32 1, %s699_s20   ;;  %s811_s18 = smov %s695_s19 }
  0xfa   : > { %p12_p5 = scmp.ge.s32.totalorder %s15_s20, 4   ;;  %s812_s19 = smov %s814_s21 }
  0xfc   :  { %14 = sbr.rel (!%p12_p5) target bundleno = 2 (0x2), region = 70 }

// kernel: mynet_forward.4
= control target key start
LH: loop header
LB: loop body
LE: loop exit
PB: predicated region body
PF: predicated region fallthrough
CT: control target
= control target key end

     0   :  { %s1855_s27 = smov 0   ;;  %s2123_s0 = inlined_call_operand.vmem [shape: bf16[2,32,256], index: 0, kind: input, shape index: {}]   ;;  %s2124_s1 = inlined_call_operand.vmem [shape: bf16[4,256,64], index: 1, kind: input, shape index: {}]   ;;  %s2125_s2 = inlined_call_operand.vmem [shape: f32[1,64], index: 2, kind: input, shape index: {}]   ;;  %s2126_s3 = inlined_call_operand.vmem [shape: f32[1,64], index: 3, kind: input, shape index: {}]   ;;  %s2127_s4 = inlined_call_operand.vmem [shape: f32[1,64], index: 4, kind: input, shape index: {}]   ;;  %s2128_s5 = inlined_call_operand.vmem [shape: bf16[64,8], index: 5, kind: input, shape index: {}]   ;;  %s2129_s6 = inlined_call_operand.vmem [shape: f32[1,8], index: 6, kind: input, shape index: {}]   ;;  %s2130_s7 = inlined_call_operand.vmem [shape: f32[1,8], index: 7, kind: input, shape index: {}]   ;;  %s2131_s8 = inlined_call_operand.vmem [shape: bf16[2,8,20], index: 8, kind: output, shape index: {}]  }
   0x1 LB: > { %s1388_s28 = sadd.s32 4294967295, %s1808_s27   ;;  %p1392_p0 = scmp.ge.s32.totalorder %s1808_s27, 1  ;;  %s1808_s27 = sphi %s1855_s27, %s18_s27  }
   0x2   : > { %p262_p1 = scmp.lt.s32.totalorder %s1808_s27, 3 }
   0x4   : > { %p263_p2 = pnand %p1392_p0, %p262_p1 }
   0x5   : > { %v1721_v0 = vld [vmem:[%s2124_s1 + $0xc0] sm:$0xff] (!%p263_p2)   ;;  %v1725_v4 = vld [vmem:[%s2124_s1 + $0xc8] sm:$0xff] (!%p263_p2)   ;;  %v1729_v8 = vld [vmem:[%s2124_s1 + $0xd0] sm:$0xff] (!%p263_p2)   ;;  %p295_p3 = scmp.lt.s32.totalorder (!%p263_p2), %s1388_s28, 1  ;;  %vm387_vm0 = vsmask.f32 (!%p263_p2), 7424 }
   0x6   : > { %266 = sbr.rel (%p263_p2) target bundleno = 656 (0x290), region = 52  ;;  %v1722_v1 = vld [vmem:[%s2124_s1 + $0x40] sm:$0xff] (!%p263_p2)   ;;  %1582 = vmatprep.subr.bf16.mxu0 (!%p263_p2), %v1721_v0  ;;  %v1726_v5 = vld [vmem:[%s2124_s1 + $0x48] sm:$0xff] (!%p263_p2)   ;;  %v1730_v9 = vld [vmem:[%s2124_s1 + $0x50] sm:$0xff] (!%p263_p2)   ;;  %vm997_vm1 = vcmask (!%p263_p2), 1044480   ;;  %vm1225_vm5 = vcmask (!%p263_p2), 523264  }
   0x7   : > { %v1723_v2 = vld [vmem:[%s2124_s1 + $0x80] sm:$0xff] (!%p263_p2)   ;;  %1610 = vmatprep.subr.bf16.mxu1 (!%p263_p2), %v1722_v1  ;;  %v1727_v6 = vld [vmem:[%s2124_s1 + $0x88] sm:$0xff] (!%p263_p2)   ;;  %v1731_v10 = vld [vmem:[%s2124_s1 + $0x90] sm:$0xff] (!%p263_p2)   ;;  %vm772_vm2 = vsmask.f32 (!%p263_p2), 5376  ;;  %vm1333_vm7 = vcmask (!%p263_p2), 158720  }
   0x8   : > { %v1724_v3 = vld [vmem:[%s2124_s1] sm:$0xff] (!%p263_p2)   ;;  %1583 = vmatpush3.bf16.msra.mxu0 (!%p263_p2), %v1723_v2  ;;  %v1728_v7 = vld [vmem:[%s2124_s1 + $0x8] sm:$0xff] (!%p263_p2)   ;;  %v1732_v11 = vld [vmem:[%s2124_s1 + $0x10] sm:$0xff] (!%p263_p2)  }
   0x9   : > { %1611 = vmatpush3.bf16.msra.mxu1 (!%p263_p2), %v1724_v3  ;;  %1584 = vmatprep.subr.bf16.mxu0 (!%p263_p2), %v1725_v4  ;;  %v1733_v12 = vld [vmem:[%s2124_s1 + $0xd8] sm:$0xff] (!%p263_p2)   ;;  %v1737_v16 = vld [vmem:[%s2124_s1 + $0xe0] sm:$0xff] (!%p263_p2)   ;;  %v1741_v20 = vld [vmem:[%s2124_s1 + $0xe8] sm:$0xff] (!%p263_p2)  }
   0xa   : > { %1612 = vmatprep.subr.bf16.mxu1 (!%p263_p2), %v1726_v5  ;;  %v1734_v13 = vld [vmem:[%s2124_s1 + $0x58] sm:$0xff] (!%p263_p2)   ;;  %v1738_v17 = vld [vmem:[%s2124_s1 + $0x60] sm:$0xff] (!%p263_p2)   ;;  %v1742_v21 = vld [vmem:[%s2124_s1 + $0x68] sm:$0xff] (!%p263_p2)  }
   0xb   : > { %v1735_v14 = vld [vmem:[%s2124_s1 + $0x98] sm:$0xff] (!%p263_p2)   ;;  %v1739_v18 = vld [vmem:[%s2124_s1 + $0xa0] sm:$0xff] (!%p263_p2)   ;;  %v1743_v22 = vld [vmem:[%s2124_s1 + $0xa8] sm:$0xff] (!%p263_p2)  }
   0xc   : > { %1585 = vmatpush3.bf16.msra.mxu0 (!%p263_p2), %v1727_v6  ;;  %v1736_v15 = vld [vmem:[%s2124_s1 + $0x18] sm:$0xff] (!%p263_p2)   ;;  %v1740_v19 = vld [vmem:[%s2124_s1 + $0x20] sm:$0xff] (!%p263_p2)   ;;  %v1744_v23 = vld [vmem:[%s2124_s1 + $0x28] sm:$0xff] (!%p263_p2)  }
   0xd   : > { %1613 = vmatpush3.bf16.msra.mxu1 %v1728_v7  ;;  %1586 = vmatprep.subr.bf16.mxu0 %v1729_v8  ;;  %s2133_s28 = smov (!%p295_p3, %s1388_s28), 1  ;;  %v1745_v24 = vld [vmem:[%s2124_s1 + $0xf0] sm:$0xff]   ;;  %v1749_v28 = vld [vmem:[%s2124_s1 + $0xf8] sm:$0xff]   ;;  %v1757_v39 = vld [vmem:[%s2124_s1 + $0x140] sm:$0xff]  }
   0xe   : > { %1614 = vmatprep.subr.bf16.mxu1 %v1730_v9  ;;  %v1746_v25 = vld [vmem:[%s2124_s1 + $0x70] sm:$0xff]   ;;  %s1581_s21 = sshll.u32 %s2133_s28, 5  ;;  %v1750_v29 = vld [vmem:[%s2124_s1 + $0x78] sm:$0xff]   ;;  %v1758_v40 = vld [vmem:[%s2124_s1 + $0x1c0] sm:$0xff]   ;;  %s1395_s20 = sshll.u32 %s2133_s28, 2 }
   0xf   : > { %v1747_v26 = vld [vmem:[%s2124_s1 + $0xb0] sm:$0xff]   ;;  %s1963_s10 = scalar_lea.vmem %s2123_s0, %s1581_s21  ;;  %v1751_v30 = vld [vmem:[%s2124_s1 + $0xb8] sm:$0xff]   ;;  %v1760_v47 = vld [vmem:[%s2124_s1 + $0x180] sm:$0xff]   ;;  %s303_s22 = scalar_lea.vmem %s2131_s8, %s1395_s20 }
  0x10   : > { %1587 = vmatpush3.bf16.msra.mxu0 %v1731_v10  ;;  %v1748_v27 = vld [vmem:[%s2124_s1 + $0x30] sm:$0xff]   ;;  %v1752_v31 = vld [vmem:[%s2124_s1 + $0x38] sm:$0xff]   ;;  %v305_v32 = vld [vmem:[%s1963_s10] sm:$0xff] }
  0x11   : > { %1615 = vmatpush3.bf16.msra.mxu1 %v1732_v11  ;;  %1588 = vmatprep.subr.bf16.mxu0 %v1733_v12  ;;  %v1973_v33 = vld [vmem:[%s1963_s10 + $0x8] sm:$0xff]  ;;  %v340_v34 = vld [vmem:[%s1963_s10 + $0x10] sm:$0x77]  ;;  %v1759_v53 = vld [vmem:[%s2124_s1 + $0x100] sm:$0xff]  }
  0x12   : > { %1616 = vmatprep.subr.bf16.mxu1 %v1734_v13  ;;  %v1429_v35 = vcombine.high %v305_v32, %v1973_v33  ;;  %v1431_v36 = vcombine.high %v340_v34, %v340_v34  ;;  %v1428_v37 = vcombine.low %v305_v32, %v1973_v33  ;;  %v1430_v38 = vcombine.low %v340_v34, %v340_v34  ;;  %v1762_v56 = vld [vmem:[%s2124_s1 + $0x1c8] sm:$0xff]   ;;  %v1766_v0 = vld [vmem:[%s2124_s1 + $0x1d0] sm:$0xff]   ;;  %v1770_v5 = vld [vmem:[%s2124_s1 + $0x1d8] sm:$0xff]  }
  0x13   : > { %v1761_v58 = vld [vmem:[%s2124_s1 + $0x148] sm:$0xff]   ;;  %v1765_v1 = vld [vmem:[%s2124_s1 + $0x150] sm:$0xff]   ;;  %v1769_v6 = vld [vmem:[%s2124_s1 + $0x158] sm:$0xff]  }
  0x14   : > { %1589 = vmatpush3.bf16.msra.mxu0 %v1735_v14  ;;  %v401_v41 = vshrl.u32 %v1429_v35, 16  ;;  %v403_v42 = vshll.u32 %v1429_v35, 16  ;;  %v408_v43 = vshll.u32 %v1431_v36, 16  ;;  %703 = vmatprep.mubr.bf16.mxu1 %v1429_v35  ;;  %v389_v44 = vshrl.u32 %v1428_v37, 16  ;;  %v1764_v61 = vld [vmem:[%s2124_s1 + $0x188] sm:$0xff]   ;;  %v1768_v2 = vld [vmem:[%s2124_s1 + $0x190] sm:$0xff]  }
  0x15   : > { %1617 = vmatpush3.bf16.msra.mxu1 %v1736_v15  ;;  %1590 = vmatprep.subr.bf16.mxu0 %v1737_v16  ;;  %v391_v45 = vshll.u32 %v1428_v37, 16  ;;  %v396_v46 = vshll.u32 %v1430_v38, 16  ;;  %v415_v54 = vshrl.u32 %v1431_v36, 16  ;;  %v1763_v62 = vld [vmem:[%s2124_s1 + $0x108] sm:$0xff]   ;;  %v412_v63 = vshrl.u32 %v1430_v38, 16  ;;  %v1767_v3 = vld [vmem:[%s2124_s1 + $0x110] sm:$0xff]  }
  0x16   : > { %1618 = vmatprep.subr.bf16.mxu1 %v1738_v17  ;;  %v405_v48 = vrot.slane %v403_v42, 1  ;;  %v410_v49 = vrot.slane %v408_v43, 1  ;;  %v1772_v7 = vld [vmem:[%s2124_s1 + $0x198] sm:$0xff]   ;;  %v1774_v9 = vld [vmem:[%s2124_s1 + $0x1e0] sm:$0xff]   ;;  %v1778_v13 = vld [vmem:[%s2124_s1 + $0x1e8] sm:$0xff]  }
  0x17   : > { %v393_v50 = vrot.slane %v391_v45, 1  ;;  %v398_v51 = vrot.slane %v396_v46, 1  ;;  %v1771_v8 = vld [vmem:[%s2124_s1 + $0x118] sm:$0xff]   ;;  %v1773_v10 = vld [vmem:[%s2124_s1 + $0x160] sm:$0xff]   ;;  %v1777_v14 = vld [vmem:[%s2124_s1 + $0x168] sm:$0xff]  }
  0x18   : > { %1591 = vmatpush3.bf16.msra.mxu0 %v1739_v18  ;;  %v406_v52 = vor.u32 %v405_v48, %v401_v41  ;;  %v417_v59 = vor.u32 %v415_v54, %v410_v49  ;;  %v1776_v11 = vld [vmem:[%s2124_s1 + $0x1a0] sm:$0xff]   ;;  %v1780_v15 = vld [vmem:[%s2124_s1 + $0x1a8] sm:$0xff]   ;;  %v307_v16 = vld [vmem:[%s1963_s10 + $0x10] sm:$0x33] }
  0x19   : > { %1619 = vmatpush3.bf16.msra.mxu1 %v1740_v19  ;;  %1592 = vmatprep.subr.bf16.mxu0 %v1741_v20  ;;  %v394_v55 = vor.u32 %v393_v50, %v389_v44  ;;  %v414_v4 = vor.u32 %v412_v63, %v398_v51  ;;  %v1775_v12 = vld [vmem:[%s2124_s1 + $0x120] sm:$0xff]   ;;  %v1779_v17 = vld [vmem:[%s2124_s1 + $0x128] sm:$0xff]   ;;  %v1449_v18 = vcombine.high %v307_v16, %v307_v16  ;;  %v1784_v20 = vld [vmem:[%s2124_s1 + $0x1f0] sm:$0xff]  }
  0x1a   : > { %1620 = vmatprep.subr.bf16.mxu1 %v1742_v21  ;;  %v411_v57 = vsel %vm387_vm0, %v406_v52, %v410_v49  ;;  %v1448_v19 = vcombine.low %v307_v16, %v307_v16  ;;  %v1783_v21 = vld [vmem:[%s2124_s1 + $0x170] sm:$0xff]   ;;  %v958_v36 = vld [vmem:[%s1963_s10] sm:$0x88] }
  0x1b   : > { %550 = vmatprep.mubr.bf16.mxu0 %v411_v57  ;;  %v399_v60 = vsel %vm387_vm0, %v394_v55, %v398_v51  ;;  %v1795_v32 = vld [vmem:[%s1963_s10 + $0x14] ss:$8 sps:$4 sm:$0x1f]   ;;  %v1550_v41 = vcombine.low %v958_v36, %v1973_v33  ;;  %v1551_v42 = vcombine.high %v958_v36, %v1973_v33 }
  0x1c   : > { %1593 = vmatpush3.bf16.msra.mxu0 %v1743_v22  ;;  %v1786_v22 = vld [vmem:[%s2124_s1 + $0x1b0] sm:$0xff]   ;;  %v1002_v45 = vrot.slane %v1795_v32, 3 }
  0x1d   : > { %1621 = vmatpush3.bf16.msra.mxu1 %v1744_v23  ;;  %1594 = vmatprep.subr.bf16.mxu0 %v1745_v24  ;;  %v1785_v23 = vld [vmem:[%s2124_s1 + $0x130] sm:$0xff]   ;;  %v1788_v24 = vld [vmem:[%s2124_s1 + $0x1f8] sm:$0xff]   ;;  %v998_v49 = vrot.slane %v1550_v41, 3  ;;  %v1001_v50 = vrot.slane %v1551_v42, 3 }
  0x1e   : > { %1622 = vmatprep.subr.bf16.mxu1 %v1746_v25  ;;  %v1787_v25 = vld [vmem:[%s2124_s1 + $0x178] sm:$0xff]  }
  0x20   : > { %1595 = vmatpush3.bf16.msra.mxu0 %v1747_v26  ;;  %v1790_v26 = vld [vmem:[%s2124_s1 + $0x1b8] sm:$0xff]  }
  0x21   : > { %1623 = vmatpush3.bf16.msra.mxu1 %v1748_v27  ;;  %1596 = vmatprep.subr.bf16.mxu0 %v1749_v28  ;;  %v719_v27 = vld [vmem:[%s1963_s10] sm:$0xcc] }
  0x22   : > { %1624 = vmatprep.subr.bf16.mxu1 %v1750_v29  ;;  %v1498_v28 = vcombine.low %v719_v27, %v1973_v33  ;;  %v1499_v29 = vcombine.high %v719_v27, %v1973_v33 }
  0x24   : > { %1597 = vmatpush3.bf16.msra.mxu0 %v1751_v30  ;;  %v1793_v30 = vld [vmem:[%s1963_s10 + $0x10] ss:$8 sps:$4 sm:$0x1f]   ;;  %v791_v34 = vshrl.u32 %v1499_v29, 16  ;;  %v794_v35 = vshll.u32 %v1499_v29, 16  ;;  %v777_v38 = vshll.u32 %v1498_v28, 16 }
  0x25   : > { %1625 = vmatpush3.bf16.msra.mxu1 %v1752_v31  ;;  %1638 = vmatprep.subr.bf16.mxu0 %v1757_v39  ;;  %v1789_v31 = vld [vmem:[%s2124_s1 + $0x138] sm:$0xff]   ;;  %v799_v39 = vshrl.u32 %v1795_v32, 16  ;;  %v785_v54 = vshll.u32 %v1793_v30, 16  ;;  %v999_v57 = vrot.slane %v1793_v30, 3 }
  0x26   : > { %1666 = vmatprep.subr.bf16.mxu1 %v1758_v40  ;;  %v802_v40 = vshll.u32 %v1795_v32, 16  ;;  %v793_v43 = vrot.slane %v791_v34, 2  ;;  %v796_v44 = vrot.slane %v794_v35, 3  ;;  %v779_v52 = vrot.slane %v777_v38, 3 }
  0x27   : > { %551 = vmatmul.mubr.bf16.vlgmr.msra.gmra.mrb[0].mxu0 %v399_v60 }
  0x28   : > { %704 = vmatmul.mubr.bf16.vlgmr.msra.gmra.mrb[0].mxu1 %v1428_v37  ;;  %1639 = vmatpush3.bf16.msra.mxu0 %v1759_v53  ;;  %v774_v37 = vshrl.u32 %v1498_v28, 16  ;;  %v804_v48 = vrot.slane %v802_v40, 3  ;;  %v797_v51 = vor.u32 %v796_v44, %v793_v43  ;;  %v782_v53 = vshrl.u32 %v1793_v30, 16  ;;  %v1568_v43 = vld [vmem:[%s2125_s2] ss:$0 sm:$0xff] }
  0x29   : > { %1667 = vmatpush3.bf16.msra.mxu1 %v1760_v47  ;;  %1640 = vmatprep.subr.bf16.mxu0 %v1761_v58  ;;  %v801_v47 = vrot.slane %v799_v39, 2 }
  0x2a   : > { %1668 = vmatprep.subr.bf16.mxu1 %v1762_v56  ;;  %558 = vmatprep.mubr.bf16.mxu0 %v417_v59  ;;  %v776_v46 = vrot.slane %v774_v37, 2  ;;  %v1003_v56 = vsel %vm997_vm1, %v1001_v50, %v1002_v45  ;;  %v784_v33 = vrot.slane %v782_v53, 2  ;;  %v787_v59 = vrot.slane %v785_v54, 3 }
  0x2b   : > { %711 = vmatprep.mubr.bf16.mxu1 %v1449_v18  ;;  %v805_v55 = vor.u32 %v804_v48, %v801_v47  ;;  %v1569_v48 = vld [vmem:[%s2126_s3] ss:$0 sm:$0xff] }
  0x2c   : > { %1641 = vmatpush3.bf16.msra.mxu0 %v1763_v62  ;;  %v780_v58 = vor.u32 %v779_v52, %v776_v46  ;;  %v788_v62 = vor.u32 %v787_v59, %v784_v33 }
  0x2d   : > { %1669 = vmatpush3.bf16.msra.mxu1 %v1764_v61  ;;  %1642 = vmatprep.subr.bf16.mxu0 %v1765_v1  ;;  %v806_v60 = vsel %vm772_vm2, %v797_v51, %v805_v55  ;;  %v1000_v61 = vsel %vm997_vm1, %v998_v49, %v999_v57  ;;  %v1799_v1 = vld [vmem:[%s2128_s5 + $0x8] sm:$0xff]  }
  0x2e   : > { %1670 = vmatprep.subr.bf16.mxu1 %v1766_v0  ;;  %v789_v63 = vsel %vm772_vm2, %v780_v58, %v788_v62  ;;  %v1798_v0 = vld [vmem:[%s2128_s5] sm:$0xff]  }
  0x2f   : > { %559 = vmatmul.mubr.bf16.gmra.mrb[4].mxu0 %v414_v4 }
  0x30   : > { %1643 = vmatpush3.bf16.msra.mxu0 %v1767_v3  ;;  %712 = vmatmul.mubr.bf16.gmra.mrb[4].mxu1 %v1448_v19  ;;  %v1801_v3 = vld [vmem:[%s2128_s5 + $0x18] sm:$0xff]  }
  0x31   : > { %1671 = vmatpush3.bf16.msra.mxu1 %v1768_v2  ;;  %1644 = vmatprep.subr.bf16.mxu0 %v1769_v6  ;;  %v1800_v2 = vld [vmem:[%s2128_s5 + $0x10] sm:$0xff]  }
  0x32   : > { %1672 = vmatprep.subr.bf16.mxu1 %v1770_v5  ;;  %1136 = vmatprep.mubr.bf16.mxu1 %v1003_v56 }
  0x33   : > { %939 = vmatprep.mubr.bf16.mxu0 %v806_v60 }
  0x34   : > { %1645 = vmatpush3.bf16.msra.mxu0 %v1771_v8 }
  0x35   : > { %1673 = vmatpush3.bf16.msra.mxu1 %v1772_v7  ;;  %1646 = vmatprep.subr.bf16.mxu0 %v1773_v10 }
  0x36   : > { %1674 = vmatprep.subr.bf16.mxu1 %v1774_v9 }
  0x38   : > { %1647 = vmatpush3.bf16.msra.mxu0 %v1775_v12 }
  0x39   : > { %1675 = vmatpush3.bf16.msra.mxu1 %v1776_v11  ;;  %1648 = vmatprep.subr.bf16.mxu0 %v1777_v14 }
  0x3a   : > { %1676 = vmatprep.subr.bf16.mxu1 %v1778_v13 }
  0x3c   : > { %1649 = vmatpush3.bf16.msra.mxu0 %v1779_v17 }
  0x3d   : > { %1677 = vmatpush3.bf16.msra.mxu1 %v1780_v15  ;;  %1650 = vmatprep.subr.bf16.mxu0 %v1783_v21 }
  0x3e   : > { %1678 = vmatprep.subr.bf16.mxu1 %v1784_v20 }
  0x40   : > { %1651 = vmatpush3.bf16.msra.mxu0 %v1785_v23 }
  0x41   : > { %1679 = vmatpush3.bf16.msra.mxu1 %v1786_v22  ;;  %1652 = vmatprep.subr.bf16.mxu0 %v1787_v25 }
  0x42   : > { %1680 = vmatprep.subr.bf16.mxu1 %v1788_v24 }
  0x44   : > { %1653 = vmatpush3.bf16.msra.mxu0 %v1789_v31 }
  0x45   : > { %1681 = vmatpush3.bf16.msra.mxu1 %v1790_v26  ;;  %1700 = vmatprep.subr.bf16.mxu0 %v1798_v0 }
  0x47   : > { %940 = vmatmul.mubr.bf16.vlgmr.msra.gmra.mrb[8].mxu0 %v789_v63 }
  0x48   : > { %1137 = vmatmul.mubr.bf16.vlgmr.msra.gmra.mrb[8].mxu1 %v1000_v61  ;;  %947 = vmatprep.mubr.bf16.mxu0 %v805_v55  ;;  %v1570_v55 = vld [vmem:[%s2127_s4] ss:$0 sm:$0xff] }
  0x49   : > { %1144 = vmatprep.mubr.bf16.mxu1 %v1002_v45  ;;  %1701 = vmatpush3.bf16.msra.mxu0 %v1798_v0 }
  0x4a   : > { %1702 = vmatprep.subr.bf16.mxu0 %v1799_v1 }
  0x4d   : > { %1703 = vmatpush3.bf16.msra.mxu0 %v1799_v1 }
  0x4e   : > { %1704 = vmatprep.subr.bf16.mxu0 %v1800_v2 }
  0x4f   : > { %948 = vmatmul.mubr.bf16.gmra.mrb[12].mxu0 %v788_v62 }
  0x50   : > { %1145 = vmatmul.mubr.bf16.gmra.mrb[12].mxu1 %v999_v57 }
  0x51   : > { %1705 = vmatpush3.bf16.msra.mxu0 %v1800_v2 }
  0x52   : > { %1706 = vmatprep.subr.bf16.mxu0 %v1801_v3 }
  0x55   : > { %1707 = vmatpush3.bf16.msra.mxu0 %v1801_v3 }
  0xfa   : > { %v1598_v10 = vpop.f32.mrb[0].mxu0 }
  0xfb   : > { %v1626_v4 = vpop.f32.mrb[0].mxu1  ;;  %v1599_v11 = vpop.f32.mrb[1].mxu0 }
  0xfc   : > { %v1627_v5 = vpop.f32.mrb[1].mxu1  ;;  %v1600_v12 = vadd.f32 %v1599_v11, %v1598_v10  ;;  %v1601_v13 = vpop.f32.mrb[2].mxu0  ;;  %v1577_v10 = vld [vmem:[%s2129_s6] ss:$0 sm:$0xff] }
  0xfd   : > { %v1628_v6 = vadd.f32 %v1627_v5, %v1626_v4  ;;  %v1629_v7 = vpop.f32.mrb[2].mxu1  ;;  %v1602_v14 = vpop.f32.mrb[3].mxu0 }
  0xfe   : > { %v1630_v8 = vpop.f32.mrb[3].mxu1  ;;  %v1603_v16 = vadd.f32 %v1602_v14, %v1601_v13  ;;  %v1578_v13 = vld [vmem:[%s2130_s7] ss:$0 sm:$0xff] }
  0xff   : > { %v1631_v9 = vadd.f32 %v1630_v8, %v1629_v7  ;;  %v706_v15 = vadd.f32 %v1628_v6, %v1600_v12 }
 0x101   : > { %v709_v17 = vadd.f32 %v1631_v9, %v1603_v16 }
 0x102   : > { %v1604_v18 = vpop.f32.mrb[4].mxu0 }
 0x103   : > { %v1605_v19 = vpop.f32.mrb[5].mxu0  ;;  %v1632_v23 = vpop.f32.mrb[4].mxu1 }
 0x104   : > { %v1606_v20 = vadd.f32 %v1605_v19, %v1604_v18  ;;  %v1607_v21 = vpop.f32.mrb[6].mxu0  ;;  %v1633_v24 = vpop.f32.mrb[5].mxu1 }
 0x105   : > { %v1608_v22 = vpop.f32.mrb[7].mxu0  ;;  %v1634_v25 = vadd.f32 %v1633_v24, %v1632_v23  ;;  %v1635_v26 = vpop.f32.mrb[6].mxu1 }
 0x106   : > { %v1636_v27 = vpop.f32.mrb[7].mxu1 }
 0x107   : > { %v714_v28 = vadd.f32 %v1634_v25, %v1606_v20 }
 0x11a   : > { %v1654_v34 = vpop.f32.mrb[8].mxu0 }
 0x11b   : > { %v1682_v29 = vpop.f32.mrb[8].mxu1  ;;  %v1655_v36 = vpop.f32.mrb[9].mxu0 }
 0x11c   : > { %v1683_v30 = vpop.f32.mrb[9].mxu1  ;;  %v1656_v38 = vadd.f32 %v1655_v36, %v1654_v34  ;;  %v1657_v39 = vpop.f32.mrb[10].mxu0 }
 0x11d   : > { %v1684_v31 = vadd.f32 %v1683_v30, %v1682_v29  ;;  %v1685_v32 = vpop.f32.mrb[10].mxu1  ;;  %v1658_v40 = vpop.f32.mrb[11].mxu0 }
 0x11e   : > { %v1686_v35 = vpop.f32.mrb[11].mxu1  ;;  %v955_v41 = vadd.f32 %v1656_v38, %v706_v15  ;;  %v1659_v42 = vadd.f32 %v1658_v40, %v1657_v39 }
 0x11f   : > { %v1687_v37 = vadd.f32 %v1686_v35, %v1685_v32 }
 0x120   : > { %v1152_v45 = vadd.f32 %v1684_v31, %v955_v41  ;;  %v956_v46 = vadd.f32 %v1659_v42, %v709_v17 }
 0x122   : > { %v1162_v51 = vmul.f32 %v1568_v43, %v1152_v45  ;;  %v1153_v52 = vadd.f32 %v1687_v37, %v956_v46  ;;  %v1660_v53 = vpop.f32.mrb[12].mxu0 }
 0x123   : > { %v1688_v44 = vpop.f32.mrb[12].mxu1  ;;  %v1661_v56 = vpop.f32.mrb[13].mxu0 }
 0x124   : > { %v1689_v47 = vpop.f32.mrb[13].mxu1  ;;  %v1172_v57 = vadd.f32 %v1569_v48, %v1162_v51  ;;  %v1163_v58 = vmul.f32 %v1568_v43, %v1153_v52  ;;  %v1662_v33 = vadd.f32 %v1661_v56, %v1660_v53  ;;  %v1663_v59 = vpop.f32.mrb[14].mxu0 }
 0x125   : > { %v1690_v49 = vadd.f32 %v1689_v47, %v1688_v44  ;;  %v1691_v50 = vpop.f32.mrb[14].mxu1  ;;  %v1664_v60 = vpop.f32.mrb[15].mxu0 }
 0x126   : > { %v1692_v54 = vpop.f32.mrb[15].mxu1  ;;  %v1185_v61 = vmul.f32 %v1570_v55, %v1172_v57  ;;  %v1173_v62 = vadd.f32 %v1569_v48, %v1163_v58  ;;  %v957_v63 = vadd.f32 %v1662_v33, %v714_v28  ;;  %vm1175_vm3 = vcmp.ge.f32.partialorder %v1172_v57, 0.0 }
 0x128   : > { %v1186_v0 = vmul.f32 %v1570_v55, %v1173_v62  ;;  %v1154_v1 = vadd.f32 %v1690_v49, %v957_v63  ;;  %vm1176_vm4 = vcmp.ge.f32.partialorder %v1173_v62, 0.0  ;;  %v1188_v3 = vsel %vm1175_vm3, %v1172_v57, %v1185_v61 }
 0x12a   : > { %v1164_v2 = vmul.f32 %v1568_v43, %v1154_v1  ;;  %v1189_v4 = vsel %vm1176_vm4, %v1173_v62, %v1186_v0 }
 0x12b   : > { %v1191_v5 = vpack.c.bf16 %v1189_v4, %v1188_v3 }
 0x12c   : > { %v1174_v6 = vadd.f32 %v1569_v48, %v1164_v2 }
 0x12d   : > { %1708 = vmatprep.mubr.msk.bf16.mxu0 %vm1225_vm5, %v1191_v5 }
 0x12e   : > { %vm1177_vm6 = vcmp.ge.f32.partialorder %v1174_v6, 0.0  ;;  %v1187_v7 = vmul.f32 %v1570_v55, %v1174_v6 }
 0x130   : > { %v1190_v8 = vsel %vm1177_vm6, %v1174_v6, %v1187_v7 }
 0x131   : > { %v1192_v9 = vpack.c.bf16 %v1190_v8, %v1190_v8 }
 0x133   : > { %1709 = vmatmul.mubr.msk.bf16.vlgmr.msra.gmra.mrb[16].mxu0 %vm1225_vm5, %v1192_v9 }
 0x206   : > { %v1710_v11 = vpop.f32.mrb[16].mxu0 }
 0x207   : > { %v1266_v12 = vpop.f32.mrb[17].mxu0  ;;  %v1289_v19 = vmul.f32 %v1710_v11, %v1577_v10 }
 0x208   : > { %v1287_v14 = vmul.f32 %v1577_v10, %v1266_v12  ;;  %v1711_v15 = vpop.f32.mrb[18].mxu0 }
 0x209   : > { %v1269_v16 = vpop.f32.mrb[19].mxu0  ;;  %v1299_v21 = vadd.f32 %v1578_v13, %v1289_v19 }
 0x20a   : > { %v1288_v17 = vmul.f32 %v1577_v10, %v1269_v16  ;;  %v1297_v18 = vadd.f32 %v1578_v13, %v1287_v14 }
 0x20c   : > { %1300 = vxpose.xlu0.b32.start [1/3] (short) (narrow) %v1297_v18, 8  ;;  %v1298_v20 = vadd.f32 %v1578_v13, %v1288_v17 }
 0x210   : > { %1301 = vxpose.xlu0.b32.cont [2/3] (short) (narrow) %v1298_v20, 8 }
 0x214   : > { %1302 = vxpose.xlu0.b32.end [3/3] (short) (narrow) %v1299_v21, 8 }
 0x28c   : > { %v1316_v22 = vpop.trf.xlu0 }
 0x28d   : > { %v1332_v23 = vpack.c.bf16 %v1316_v22, %v1316_v22 }
 0x28f   : > { %1334 = vst.msk [vmem:[%s303_s22] sm:$0xf] %vm1333_vm7, %v1332_v23 }
 0x290 PF: > { %s18_s27 = sadd.s32 1, %s1808_s27  }
 0x291   : > { %p15_p4 = scmp.ge.s32.totalorder %s18_s27, 4  }
 0x293   :  { %17 = sbr.rel (!%p15_p4) target bundleno = 1 (0x1), region = 85 }

// kernel: mynet_forward.5
= control target key start
LH: loop header
LB: loop body
LE: loop exit
PB: predicated region body
PF: predicated region fallthrough
CT: control target
= control target key end

     0   :  { %vm29_vm0 = vcmask 1041408   ;;  %v1890_v1 = vmov 0.0   ;;  %vm1891_vm1 = vmmov 0   ;;  %vm25_vm2 = vcmask 31744   ;;  %s2195_s0 = inlined_call_operand.vmem [shape: bf16[16,4,5], index: 0, kind: input, shape index: {}]   ;;  %s2196_s1 = inlined_call_operand.vmem [shape: bf16[16,4], index: 1, kind: input, shape index: {}]   ;;  %s2197_s2 = inlined_call_operand.vmem [shape: bf16[5,16], index: 2, kind: input, shape index: {}]   ;;  %s2198_s3 = inlined_call_operand.hbm [shape: f32[16,16,16], index: 3, kind: output, shape index: {}]  }
   0x1   :  { %v19_v0 = vld [vmem:[%s2195_s0] sm:$0x3]  ;;  %1667 = vmatprep.subr.bf16.mxu0 %v1890_v1  ;;  %1669 = vmatprep.mubr.msk.bf16.mxu0 %vm1891_vm1, %v1890_v1  ;;  %v1558_v4 = vld [vmem:[%s2195_s0 + $0x2] sm:$0x3]  ;;  %v1561_v6 = vld [vmem:[%s2195_s0 + $0x4] sm:$0x3] }
   0x2   :  { %v31_v2 = vsel %vm29_vm0, %v19_v0, 0  ;;  %v1926_v3 = vld [vmem:[%s2196_s1] sm:$0xff]   ;;  %1673 = vmatprep.subr.bf16.mxu1 %v1890_v1  ;;  %v132_v5 = vsel %vm29_vm0, %v1558_v4, 0  ;;  %1675 = vmatprep.mubr.msk.bf16.mxu1 %vm1891_vm1, %v1890_v1 }
   0x3   :  { %1668 = vmatpush3.bf16.msra.mxu0 %v31_v2 }
   0x4   :  { %1679 = vmatprep.subr.bf16.mxu0 %v1890_v1 }
   0x6   :  { %1670 = vmatmul.mubr.msk.bf16.vlgmr.msra.gmra.mrb[0].mxu0 %vm25_vm2, %v1926_v3 }
   0x7   :  { %1680 = vmatpush3.bf16.msra.mxu0 %v132_v5  ;;  %1681 = vmatprep.mubr.msk.bf16.mxu0 %vm1891_vm1, %v1890_v1 }
   0x8   :  { %1691 = vmatprep.subr.bf16.mxu0 %v1890_v1 }
   0x9   :  { %8 = vsyncpa [#allocation3], 0  ;;  %v226_v7 = vsel %vm29_vm0, %v1561_v6, 0  ;;  %v1564_v8 = vld [vmem:[%s2195_s0 + $0x6] sm:$0x3]  ;;  %vm79_vm3 = vcmask 1042432  }
   0xa   :  { %v320_v9 = vsel %vm29_vm0, %v1564_v8, 0  ;;  %v1567_v10 = vld [vmem:[%s2195_s0 + $0x8] sm:$0x3]  ;;  %v1570_v12 = vld [vmem:[%s2195_s0 + $0xa] sm:$0x3]  ;;  %v1892_v26 = vmov 65535  }
   0xb   :  { %v414_v11 = vsel %vm29_vm0, %v1567_v10, 0  ;;  %v508_v13 = vsel %vm29_vm0, %v1570_v12, 0  ;;  %v1573_v14 = vld [vmem:[%s2195_s0 + $0xc] sm:$0x3]  ;;  %v1576_v16 = vld [vmem:[%s2195_s0 + $0xe] sm:$0x3] }
   0xc   :  { %v602_v15 = vsel %vm29_vm0, %v1573_v14, 0  ;;  %v696_v17 = vsel %vm29_vm0, %v1576_v16, 0  ;;  %v1579_v18 = vld [vmem:[%s2195_s0 + $0x10] sm:$0x3]  ;;  %v1582_v20 = vld [vmem:[%s2195_s0 + $0x12] sm:$0x3] }
   0xd   :  { %v790_v19 = vsel %vm29_vm0, %v1579_v18, 0  ;;  %v884_v21 = vsel %vm29_vm0, %v1582_v20, 0  ;;  %v1585_v22 = vld [vmem:[%s2195_s0 + $0x14] sm:$0x3]  ;;  %v1588_v24 = vld [vmem:[%s2195_s0 + $0x16] sm:$0x3] }
   0xe   :  { %1682 = vmatmul.mubr.msk.bf16.vlgmr.msra.gmra.mrb[4].mxu0 %vm25_vm2, %v1926_v3  ;;  %v978_v23 = vsel %vm29_vm0, %v1585_v22, 0  ;;  %v1072_v25 = vsel %vm29_vm0, %v1588_v24, 0  ;;  %v80_v27 = vsel %vm29_vm0, 4294967295, %v1892_v26  ;;  %v18_v28 = vld [vmem:[%s2197_s2] sm:$0x7]  ;;  %vm75_vm4 = vcmask 39936  }
   0xf   :  { %1692 = vmatpush3.bf16.msra.mxu0 %v226_v7  ;;  %1693 = vmatprep.mubr.msk.bf16.mxu0 %vm1891_vm1, %v1890_v1  ;;  %v81_v29 = vsel %vm79_vm3, %v80_v27, 0  ;;  %v1591_v30 = vld [vmem:[%s2195_s0 + $0x18] sm:$0x3]  ;;  %v1594_v33 = vld [vmem:[%s2195_s0 + $0x1a] sm:$0x3]  ;;  %vm126_vm5 = vcmask 130048  }
  0x10   :  { %1703 = vmatprep.subr.bf16.mxu0 %v1890_v1  ;;  %v2038_v31 = vand.u32 %v81_v29, %v18_v28  ;;  %v1166_v32 = vsel %vm29_vm0, %v1591_v30, 0  ;;  %v1260_v34 = vsel %vm29_vm0, %v1594_v33, 0  ;;  %v1597_v35 = vld [vmem:[%s2195_s0 + $0x1c] sm:$0x3]  ;;  %v1600_v37 = vld [vmem:[%s2195_s0 + $0x1e] sm:$0x3] }
  0x11   :  { %v1354_v36 = vsel %vm29_vm0, %v1597_v35, 0  ;;  %v1448_v38 = vsel %vm29_vm0, %v1600_v37, 0  ;;  %s1893_s0 = smov [#allocation2]  }
  0x12   :  { %1674 = vmatpush3.bf16.msra.mxu1 %v2038_v31  ;;  %s1544_s18 = sshll.u32 %s1893_s0, 4  ;;  %s1545_s18 = int_to_ptr.vmem [resolvable:$true] %s1544_s18 }
  0x13   :  { %1685 = vmatprep.subr.bf16.mxu1 %v1890_v1  ;;  %s1866_s19 = scalar_lea.vmem %s1545_s18, 4096  ;;  %p1871_p1 = scmp.lt.s32.totalorder %s1545_s18, %s1545_s18 }
  0x14   :  { %p1867_p0 = scmp.ne.s32.totalorder %s1545_s18, %s1866_s19  ;;  %p1872_p2 = scmp.lt.s32.totalorder %s1866_s19, %s1866_s19 }
  0x16   :  { %1694 = vmatmul.mubr.msk.bf16.vlgmr.msra.gmra.mrb[8].mxu0 %vm25_vm2, %v1926_v3  ;;  %p1873_p3 = por %p1872_p2, %p1871_p1 }
  0x17   :  { %1704 = vmatpush3.bf16.msra.mxu0 %v320_v9  ;;  %1705 = vmatprep.mubr.msk.bf16.mxu0 %vm1891_vm1, %v1890_v1 }
  0x18   :  { %1715 = vmatprep.subr.bf16.mxu0 %v1890_v1  ;;  %p1874_p4 = pnand %p1873_p3, %p1867_p0 }
  0x1e   :  { %1706 = vmatmul.mubr.msk.bf16.vlgmr.msra.gmra.mrb[12].mxu0 %vm25_vm2, %v1926_v3 }
  0x1f   :  { %1716 = vmatpush3.bf16.msra.mxu0 %v414_v11  ;;  %1717 = vmatprep.mubr.msk.bf16.mxu0 %vm1891_vm1, %v1890_v1 }
  0x20   :  { %1727 = vmatprep.subr.bf16.mxu0 %v1890_v1 }
  0x26   :  { %1718 = vmatmul.mubr.msk.bf16.vlgmr.msra.gmra.mrb[16].mxu0 %vm25_vm2, %v1926_v3 }
  0x27   :  { %1728 = vmatpush3.bf16.msra.mxu0 %v508_v13  ;;  %1729 = vmatprep.mubr.msk.bf16.mxu0 %vm1891_vm1, %v1890_v1 }
  0x28   :  { %1739 = vmatprep.subr.bf16.mxu0 %v1890_v1 }
  0x2e   :  { %1730 = vmatmul.mubr.msk.bf16.vlgmr.msra.gmra.mrb[20].mxu0 %vm25_vm2, %v1926_v3 }
  0x2f   :  { %1740 = vmatpush3.bf16.msra.mxu0 %v602_v15  ;;  %1741 = vmatprep.mubr.msk.bf16.mxu0 %vm1891_vm1, %v1890_v1 }
  0x30   :  { %1751 = vmatprep.subr.bf16.mxu0 %v1890_v1 }
  0x36   :  { %1742 = vmatmul.mubr.msk.bf16.vlgmr.msra.gmra.mrb[24].mxu0 %vm25_vm2, %v1926_v3 }
  0x37   :  { %1752 = vmatpush3.bf16.msra.mxu0 %v696_v17  ;;  %1753 = vmatprep.mubr.msk.bf16.mxu0 %vm1891_vm1, %v1890_v1 }
  0x38   :  { %1763 = vmatprep.subr.bf16.mxu0 %v1890_v1 }
  0x3e   :  { %1754 = vmatmul.mubr.msk.bf16.vlgmr.msra.gmra.mrb[28].mxu0 %vm25_vm2, %v1926_v3 }
  0x3f   :  { %1764 = vmatpush3.bf16.msra.mxu0 %v790_v19  ;;  %1765 = vmatprep.mubr.msk.bf16.mxu0 %vm1891_vm1, %v1890_v1 }
  0x40   :  { %1775 = vmatprep.subr.bf16.mxu0 %v1890_v1 }
  0x46   :  { %1766 = vmatmul.mubr.msk.bf16.vlgmr.msra.gmra.mrb[32].mxu0 %vm25_vm2, %v1926_v3 }
  0x47   :  { %1776 = vmatpush3.bf16.msra.mxu0 %v884_v21  ;;  %1777 = vmatprep.mubr.msk.bf16.mxu0 %vm1891_vm1, %v1890_v1 }
  0x48   :  { %1787 = vmatprep.subr.bf16.mxu0 %v1890_v1 }
  0x4e   :  { %1778 = vmatmul.mubr.msk.bf16.vlgmr.msra.gmra.mrb[36].mxu0 %vm25_vm2, %v1926_v3 }
  0x4f   :  { %1788 = vmatpush3.bf16.msra.mxu0 %v978_v23  ;;  %1789 = vmatprep.mubr.msk.bf16.mxu0 %vm1891_vm1, %v1890_v1 }
  0x50   :  { %1799 = vmatprep.subr.bf16.mxu0 %v1890_v1 }
  0x56   :  { %1790 = vmatmul.mubr.msk.bf16.vlgmr.msra.gmra.mrb[40].mxu0 %vm25_vm2, %v1926_v3 }
  0x57   :  { %1800 = vmatpush3.bf16.msra.mxu0 %v1072_v25  ;;  %1801 = vmatprep.mubr.msk.bf16.mxu0 %vm1891_vm1, %v1890_v1 }
  0x58   :  { %1811 = vmatprep.subr.bf16.mxu0 %v1890_v1 }
  0x5e   :  { %1802 = vmatmul.mubr.msk.bf16.vlgmr.msra.gmra.mrb[44].mxu0 %vm25_vm2, %v1926_v3 }
  0x5f   :  { %1812 = vmatpush3.bf16.msra.mxu0 %v1166_v32  ;;  %1813 = vmatprep.mubr.msk.bf16.mxu0 %vm1891_vm1, %v1890_v1 }
  0x60   :  { %1823 = vmatprep.subr.bf16.mxu0 %v1890_v1 }
  0x66   :  { %1814 = vmatmul.mubr.msk.bf16.vlgmr.msra.gmra.mrb[48].mxu0 %vm25_vm2, %v1926_v3 }
  0x67   :  { %1824 = vmatpush3.bf16.msra.mxu0 %v1260_v34  ;;  %1825 = vmatprep.mubr.msk.bf16.mxu0 %vm1891_vm1, %v1890_v1 }
  0x68   :  { %1835 = vmatprep.subr.bf16.mxu0 %v1890_v1 }
  0x6e   :  { %1826 = vmatmul.mubr.msk.bf16.vlgmr.msra.gmra.mrb[52].mxu0 %vm25_vm2, %v1926_v3 }
  0x6f   :  { %1836 = vmatpush3.bf16.msra.mxu0 %v1354_v36  ;;  %1837 = vmatprep.mubr.msk.bf16.mxu0 %vm1891_vm1, %v1890_v1 }
  0x70   :  { %1847 = vmatprep.subr.bf16.mxu0 %v1890_v1 }
  0x76   :  { %1838 = vmatmul.mubr.msk.bf16.vlgmr.msra.gmra.mrb[56].mxu0 %vm25_vm2, %v1926_v3 }
  0x77   :  { %1848 = vmatpush3.bf16.msra.mxu0 %v1448_v38  ;;  %1849 = vmatprep.mubr.msk.bf16.mxu0 %vm1891_vm1, %v1890_v1 }
  0x7e   :  { %1850 = vmatmul.mubr.msk.bf16.vlgmr.msra.gmra.mrb[60].mxu0 %vm25_vm2, %v1926_v3 }
  0xd9   :  { %v67_v39 = vpop.f32.mrb[0].mxu0 }
  0xda   :  { %v1671_v40 = vpop.f32.mrb[1].mxu0 }
  0xdb   :  { %v70_v41 = vpop.f32.mrb[2].mxu0 }
  0xdc   :  { %v74_v42 = vpack.c.bf16 %v70_v41, %v67_v39  ;;  %v1672_v43 = vpop.f32.mrb[3].mxu0 }
  0xde   :  { %1676 = vmatmul.mubr.msk.bf16.vlgmr.msra.gmra.mrb[0].mxu1 %vm75_vm4, %v74_v42 }
  0xdf   :  { %1686 = vmatpush3.bf16.msra.mxu1 %v2038_v31  ;;  %1687 = vmatprep.mubr.msk.bf16.mxu1 %vm1891_vm1, %v1890_v1 }
  0xe0   :  { %1697 = vmatprep.subr.bf16.mxu1 %v1890_v1 }
  0xe1   :  { %v168_v44 = vpop.f32.mrb[4].mxu0 }
  0xe2   :  { %v1683_v45 = vpop.f32.mrb[5].mxu0 }
  0xe3   :  { %v171_v46 = vpop.f32.mrb[6].mxu0 }
  0xe4   :  { %v175_v47 = vpack.c.bf16 %v171_v46, %v168_v44  ;;  %v1684_v48 = vpop.f32.mrb[7].mxu0 }
  0xe6   :  { %1688 = vmatmul.mubr.msk.bf16.vlgmr.msra.gmra.mrb[4].mxu1 %vm75_vm4, %v175_v47 }
  0xe7   :  { %1698 = vmatpush3.bf16.msra.mxu1 %v2038_v31  ;;  %1699 = vmatprep.mubr.msk.bf16.mxu1 %vm1891_vm1, %v1890_v1 }
  0xe8   :  { %1709 = vmatprep.subr.bf16.mxu1 %v1890_v1 }
  0xe9   :  { %v262_v49 = vpop.f32.mrb[8].mxu0 }
  0xea   :  { %v1695_v50 = vpop.f32.mrb[9].mxu0 }
  0xeb   :  { %v265_v51 = vpop.f32.mrb[10].mxu0 }
  0xec   :  { %v269_v52 = vpack.c.bf16 %v265_v51, %v262_v49  ;;  %v1696_v53 = vpop.f32.mrb[11].mxu0 }
  0xee   :  { %1700 = vmatmul.mubr.msk.bf16.vlgmr.msra.gmra.mrb[8].mxu1 %vm75_vm4, %v269_v52 }
  0xef   :  { %1710 = vmatpush3.bf16.msra.mxu1 %v2038_v31  ;;  %1711 = vmatprep.mubr.msk.bf16.mxu1 %vm1891_vm1, %v1890_v1 }
  0xf0   :  { %1721 = vmatprep.subr.bf16.mxu1 %v1890_v1 }
  0xf1   :  { %v356_v54 = vpop.f32.mrb[12].mxu0 }
  0xf2   :  { %v1707_v55 = vpop.f32.mrb[13].mxu0 }
  0xf3   :  { %v359_v56 = vpop.f32.mrb[14].mxu0 }
  0xf4   :  { %v363_v57 = vpack.c.bf16 %v359_v56, %v356_v54  ;;  %v1708_v58 = vpop.f32.mrb[15].mxu0 }
  0xf6   :  { %1712 = vmatmul.mubr.msk.bf16.vlgmr.msra.gmra.mrb[12].mxu1 %vm75_vm4, %v363_v57 }
  0xf7   :  { %1722 = vmatpush3.bf16.msra.mxu1 %v2038_v31  ;;  %1723 = vmatprep.mubr.msk.bf16.mxu1 %vm1891_vm1, %v1890_v1 }
  0xf8   :  { %1733 = vmatprep.subr.bf16.mxu1 %v1890_v1 }
  0xf9   :  { %v450_v59 = vpop.f32.mrb[16].mxu0 }
  0xfa   :  { %v1719_v60 = vpop.f32.mrb[17].mxu0 }
  0xfb   :  { %v453_v61 = vpop.f32.mrb[18].mxu0 }
  0xfc   :  { %v457_v62 = vpack.c.bf16 %v453_v61, %v450_v59  ;;  %v1720_v63 = vpop.f32.mrb[19].mxu0 }
  0xfe   :  { %1724 = vmatmul.mubr.msk.bf16.vlgmr.msra.gmra.mrb[16].mxu1 %vm75_vm4, %v457_v62 }
  0xff   :  { %1734 = vmatpush3.bf16.msra.mxu1 %v2038_v31  ;;  %1735 = vmatprep.mubr.msk.bf16.mxu1 %vm1891_vm1, %v1890_v1 }
 0x100   :  { %1745 = vmatprep.subr.bf16.mxu1 %v1890_v1 }
 0x101   :  { %v544_v0 = vpop.f32.mrb[20].mxu0 }
 0x102   :  { %v1731_v2 = vpop.f32.mrb[21].mxu0 }
 0x103   :  { %v547_v3 = vpop.f32.mrb[22].mxu0 }
 0x104   :  { %v551_v4 = vpack.c.bf16 %v547_v3, %v544_v0  ;;  %v1732_v5 = vpop.f32.mrb[23].mxu0 }
 0x106   :  { %1736 = vmatmul.mubr.msk.bf16.vlgmr.msra.gmra.mrb[20].mxu1 %vm75_vm4, %v551_v4 }
 0x107   :  { %1746 = vmatpush3.bf16.msra.mxu1 %v2038_v31  ;;  %1747 = vmatprep.mubr.msk.bf16.mxu1 %vm1891_vm1, %v1890_v1 }
 0x108   :  { %1757 = vmatprep.subr.bf16.mxu1 %v1890_v1 }
 0x109   :  { %v638_v6 = vpop.f32.mrb[24].mxu0 }
 0x10a   :  { %v1743_v7 = vpop.f32.mrb[25].mxu0 }
 0x10b   :  { %v641_v8 = vpop.f32.mrb[26].mxu0 }
 0x10c   :  { %v645_v9 = vpack.c.bf16 %v641_v8, %v638_v6  ;;  %v1744_v10 = vpop.f32.mrb[27].mxu0 }
 0x10e   :  { %1748 = vmatmul.mubr.msk.bf16.vlgmr.msra.gmra.mrb[24].mxu1 %vm75_vm4, %v645_v9 }
 0x10f   :  { %1758 = vmatpush3.bf16.msra.mxu1 %v2038_v31  ;;  %1759 = vmatprep.mubr.msk.bf16.mxu1 %vm1891_vm1, %v1890_v1 }
 0x110   :  { %1769 = vmatprep.subr.bf16.mxu1 %v1890_v1 }
 0x111   :  { %v732_v11 = vpop.f32.mrb[28].mxu0 }
 0x112   :  { %v1755_v12 = vpop.f32.mrb[29].mxu0 }
 0x113   :  { %v735_v13 = vpop.f32.mrb[30].mxu0 }
 0x114   :  { %v739_v14 = vpack.c.bf16 %v735_v13, %v732_v11  ;;  %v1756_v15 = vpop.f32.mrb[31].mxu0 }
 0x116   :  { %1760 = vmatmul.mubr.msk.bf16.vlgmr.msra.gmra.mrb[28].mxu1 %vm75_vm4, %v739_v14 }
 0x117   :  { %1770 = vmatpush3.bf16.msra.mxu1 %v2038_v31  ;;  %1771 = vmatprep.mubr.msk.bf16.mxu1 %vm1891_vm1, %v1890_v1 }
 0x118   :  { %1781 = vmatprep.subr.bf16.mxu1 %v1890_v1 }
 0x119   :  { %v826_v16 = vpop.f32.mrb[32].mxu0 }
 0x11a   :  { %v1767_v17 = vpop.f32.mrb[33].mxu0 }
 0x11b   :  { %v829_v18 = vpop.f32.mrb[34].mxu0 }
 0x11c   :  { %v833_v19 = vpack.c.bf16 %v829_v18, %v826_v16  ;;  %v1768_v20 = vpop.f32.mrb[35].mxu0 }
 0x11e   :  { %1772 = vmatmul.mubr.msk.bf16.vlgmr.msra.gmra.mrb[32].mxu1 %vm75_vm4, %v833_v19 }
 0x11f   :  { %1782 = vmatpush3.bf16.msra.mxu1 %v2038_v31  ;;  %1783 = vmatprep.mubr.msk.bf16.mxu1 %vm1891_vm1, %v1890_v1 }
 0x120   :  { %1793 = vmatprep.subr.bf16.mxu1 %v1890_v1 }
 0x121   :  { %v920_v21 = vpop.f32.mrb[36].mxu0 }
 0x122   :  { %v1779_v22 = vpop.f32.mrb[37].mxu0 }
 0x123   :  { %v923_v23 = vpop.f32.mrb[38].mxu0 }
 0x124   :  { %v927_v24 = vpack.c.bf16 %v923_v23, %v920_v21  ;;  %v1780_v25 = vpop.f32.mrb[39].mxu0 }
 0x126   :  { %1784 = vmatmul.mubr.msk.bf16.vlgmr.msra.gmra.mrb[36].mxu1 %vm75_vm4, %v927_v24 }
 0x127   :  { %1794 = vmatpush3.bf16.msra.mxu1 %v2038_v31  ;;  %1795 = vmatprep.mubr.msk.bf16.mxu1 %vm1891_vm1, %v1890_v1 }
 0x128   :  { %1805 = vmatprep.subr.bf16.mxu1 %v1890_v1 }
 0x129   :  { %v1014_v26 = vpop.f32.mrb[40].mxu0 }
 0x12a   :  { %v1791_v27 = vpop.f32.mrb[41].mxu0 }
 0x12b   :  { %v1017_v28 = vpop.f32.mrb[42].mxu0 }
 0x12c   :  { %v1021_v29 = vpack.c.bf16 %v1017_v28, %v1014_v26  ;;  %v1792_v30 = vpop.f32.mrb[43].mxu0 }
 0x12e   :  { %1796 = vmatmul.mubr.msk.bf16.vlgmr.msra.gmra.mrb[40].mxu1 %vm75_vm4, %v1021_v29 }
 0x12f   :  { %1806 = vmatpush3.bf16.msra.mxu1 %v2038_v31  ;;  %1807 = vmatprep.mubr.msk.bf16.mxu1 %vm1891_vm1, %v1890_v1 }
 0x130   :  { %1817 = vmatprep.subr.bf16.mxu1 %v1890_v1 }
 0x131   :  { %v1108_v32 = vpop.f32.mrb[44].mxu0 }
 0x132   :  { %v1803_v33 = vpop.f32.mrb[45].mxu0 }
 0x133   :  { %v1111_v34 = vpop.f32.mrb[46].mxu0 }
 0x134   :  { %v1115_v35 = vpack.c.bf16 %v1111_v34, %v1108_v32  ;;  %v1804_v36 = vpop.f32.mrb[47].mxu0 }
 0x136   :  { %1808 = vmatmul.mubr.msk.bf16.vlgmr.msra.gmra.mrb[44].mxu1 %vm75_vm4, %v1115_v35 }
 0x137   :  { %1818 = vmatpush3.bf16.msra.mxu1 %v2038_v31  ;;  %1819 = vmatprep.mubr.msk.bf16.mxu1 %vm1891_vm1, %v1890_v1 }
 0x138   :  { %1829 = vmatprep.subr.bf16.mxu1 %v1890_v1 }
 0x139   :  { %v1202_v37 = vpop.f32.mrb[48].mxu0 }
 0x13a   :  { %v1815_v38 = vpop.f32.mrb[49].mxu0 }
 0x13b   :  { %v1205_v39 = vpop.f32.mrb[50].mxu0 }
 0x13c   :  { %v1209_v40 = vpack.c.bf16 %v1205_v39, %v1202_v37  ;;  %v1816_v41 = vpop.f32.mrb[51].mxu0 }
 0x13e   :  { %1820 = vmatmul.mubr.msk.bf16.vlgmr.msra.gmra.mrb[48].mxu1 %vm75_vm4, %v1209_v40 }
 0x13f   :  { %1830 = vmatpush3.bf16.msra.mxu1 %v2038_v31  ;;  %1831 = vmatprep.mubr.msk.bf16.mxu1 %vm1891_vm1, %v1890_v1 }
 0x140   :  { %1841 = vmatprep.subr.bf16.mxu1 %v1890_v1 }
 0x141   :  { %v1296_v42 = vpop.f32.mrb[52].mxu0 }
 0x142   :  { %v1827_v43 = vpop.f32.mrb[53].mxu0 }
 0x143   :  { %v1299_v44 = vpop.f32.mrb[54].mxu0 }
 0x144   :  { %v1303_v45 = vpack.c.bf16 %v1299_v44, %v1296_v42  ;;  %v1828_v46 = vpop.f32.mrb[55].mxu0 }
 0x146   :  { %1832 = vmatmul.mubr.msk.bf16.vlgmr.msra.gmra.mrb[52].mxu1 %vm75_vm4, %v1303_v45 }
 0x147   :  { %1842 = vmatpush3.bf16.msra.mxu1 %v2038_v31  ;;  %1843 = vmatprep.mubr.msk.bf16.mxu1 %vm1891_vm1, %v1890_v1 }
 0x148   :  { %1853 = vmatprep.subr.bf16.mxu1 %v1890_v1 }
 0x149   :  { %v1390_v47 = vpop.f32.mrb[56].mxu0 }
 0x14a   :  { %v1839_v48 = vpop.f32.mrb[57].mxu0 }
 0x14b   :  { %v1393_v49 = vpop.f32.mrb[58].mxu0 }
 0x14c   :  { %v1397_v50 = vpack.c.bf16 %v1393_v49, %v1390_v47  ;;  %v1840_v51 = vpop.f32.mrb[59].mxu0 }
 0x14e   :  { %1844 = vmatmul.mubr.msk.bf16.vlgmr.msra.gmra.mrb[56].mxu1 %vm75_vm4, %v1397_v50 }
 0x14f   :  { %1854 = vmatpush3.bf16.msra.mxu1 %v2038_v31  ;;  %1855 = vmatprep.mubr.msk.bf16.mxu1 %vm1891_vm1, %v1890_v1 }
 0x151   :  { %v1484_v52 = vpop.f32.mrb[60].mxu0 }
 0x152   :  { %v1851_v53 = vpop.f32.mrb[61].mxu0 }
 0x153   :  { %v1487_v54 = vpop.f32.mrb[62].mxu0 }
 0x154   :  { %v1491_v55 = vpack.c.bf16 %v1487_v54, %v1484_v52  ;;  %v1852_v56 = vpop.f32.mrb[63].mxu0 }
 0x156   :  { %1856 = vmatmul.mubr.msk.bf16.vlgmr.msra.gmra.mrb[60].mxu1 %vm75_vm4, %v1491_v55 }
 0x1b1   :  { %v119_v57 = vpop.f32.mrb[0].mxu1 }
 0x1b2   :  { %127 = vst.msk [vmem:[#allocation2] sm:$0xff] %vm126_vm5, %v119_v57  ;;  %v1677_v58 = vpop.f32.mrb[1].mxu1 }
 0x1b3   :  { %v122_v59 = vpop.f32.mrb[2].mxu1 }
 0x1b4   :  { %128 = vst.msk [vmem:[#allocation2 + $0x8] sm:$0xff] %vm126_vm5, %v122_v59  ;;  %v1678_v60 = vpop.f32.mrb[3].mxu1 }
 0x1b9   :  { %v213_v31 = vpop.f32.mrb[4].mxu1 }
 0x1ba   :  { %221 = vst.msk [vmem:[#allocation2 + $0x10] sm:$0xff] %vm126_vm5, %v213_v31  ;;  %v1689_v1 = vpop.f32.mrb[5].mxu1 }
 0x1bb   :  { %v216_v61 = vpop.f32.mrb[6].mxu1 }
 0x1bc   :  { %222 = vst.msk [vmem:[#allocation2 + $0x18] sm:$0xff] %vm126_vm5, %v216_v61  ;;  %v1690_v62 = vpop.f32.mrb[7].mxu1 }
 0x1c1   :  { %v307_v63 = vpop.f32.mrb[8].mxu1 }
 0x1c2   :  { %315 = vst.msk [vmem:[#allocation2 + $0x20] sm:$0xff] %vm126_vm5, %v307_v63  ;;  %v1701_v0 = vpop.f32.mrb[9].mxu1 }
 0x1c3   :  { %v310_v2 = vpop.f32.mrb[10].mxu1 }
 0x1c4   :  { %316 = vst.msk [vmem:[#allocation2 + $0x28] sm:$0xff] %vm126_vm5, %v310_v2  ;;  %v1702_v3 = vpop.f32.mrb[11].mxu1 }
 0x1c9   :  { %v401_v4 = vpop.f32.mrb[12].mxu1 }
 0x1ca   :  { %409 = vst.msk [vmem:[#allocation2 + $0x30] sm:$0xff] %vm126_vm5, %v401_v4  ;;  %v1713_v5 = vpop.f32.mrb[13].mxu1 }
 0x1cb   :  { %v404_v6 = vpop.f32.mrb[14].mxu1 }
 0x1cc   :  { %410 = vst.msk [vmem:[#allocation2 + $0x38] sm:$0xff] %vm126_vm5, %v404_v6  ;;  %v1714_v7 = vpop.f32.mrb[15].mxu1 }
 0x1d1   :  { %v495_v8 = vpop.f32.mrb[16].mxu1 }
 0x1d2   :  { %503 = vst.msk [vmem:[#allocation2 + $0x40] sm:$0xff] %vm126_vm5, %v495_v8  ;;  %v1725_v9 = vpop.f32.mrb[17].mxu1 }
 0x1d3   :  { %v498_v10 = vpop.f32.mrb[18].mxu1 }
 0x1d4   :  { %504 = vst.msk [vmem:[#allocation2 + $0x48] sm:$0xff] %vm126_vm5, %v498_v10  ;;  %v1726_v11 = vpop.f32.mrb[19].mxu1 }
 0x1d9   :  { %v589_v12 = vpop.f32.mrb[20].mxu1 }
 0x1da   :  { %597 = vst.msk [vmem:[#allocation2 + $0x50] sm:$0xff] %vm126_vm5, %v589_v12  ;;  %v1737_v13 = vpop.f32.mrb[21].mxu1 }
 0x1db   :  { %v592_v14 = vpop.f32.mrb[22].mxu1 }
 0x1dc   :  { %598 = vst.msk [vmem:[#allocation2 + $0x58] sm:$0xff] %vm126_vm5, %v592_v14  ;;  %v1738_v15 = vpop.f32.mrb[23].mxu1 }
 0x1e1   :  { %v683_v16 = vpop.f32.mrb[24].mxu1 }
 0x1e2   :  { %691 = vst.msk [vmem:[#allocation2 + $0x60] sm:$0xff] %vm126_vm5, %v683_v16  ;;  %v1749_v17 = vpop.f32.mrb[25].mxu1 }
 0x1e3   :  { %v686_v18 = vpop.f32.mrb[26].mxu1 }
 0x1e4   :  { %692 = vst.msk [vmem:[#allocation2 + $0x68] sm:$0xff] %vm126_vm5, %v686_v18  ;;  %v1750_v19 = vpop.f32.mrb[27].mxu1 }
 0x1e9   :  { %v777_v20 = vpop.f32.mrb[28].mxu1 }
 0x1ea   :  { %785 = vst.msk [vmem:[#allocation2 + $0x70] sm:$0xff] %vm126_vm5, %v777_v20  ;;  %v1761_v21 = vpop.f32.mrb[29].mxu1 }
 0x1eb   :  { %v780_v22 = vpop.f32.mrb[30].mxu1 }
 0x1ec   :  { %786 = vst.msk [vmem:[#allocation2 + $0x78] sm:$0xff] %vm126_vm5, %v780_v22  ;;  %v1762_v23 = vpop.f32.mrb[31].mxu1 }
 0x1f1   :  { %v871_v24 = vpop.f32.mrb[32].mxu1 }
 0x1f2   :  { %879 = vst.msk [vmem:[#allocation2 + $0x80] sm:$0xff] %vm126_vm5, %v871_v24  ;;  %v1773_v25 = vpop.f32.mrb[33].mxu1 }
 0x1f3   :  { %v874_v26 = vpop.f32.mrb[34].mxu1 }
 0x1f4   :  { %880 = vst.msk [vmem:[#allocation2 + $0x88] sm:$0xff] %vm126_vm5, %v874_v26  ;;  %v1774_v27 = vpop.f32.mrb[35].mxu1 }
 0x1f9   :  { %v965_v28 = vpop.f32.mrb[36].mxu1 }
 0x1fa   :  { %973 = vst.msk [vmem:[#allocation2 + $0x90] sm:$0xff] %vm126_vm5, %v965_v28  ;;  %v1785_v29 = vpop.f32.mrb[37].mxu1 }
 0x1fb   :  { %v968_v30 = vpop.f32.mrb[38].mxu1 }
 0x1fc   :  { %974 = vst.msk [vmem:[#allocation2 + $0x98] sm:$0xff] %vm126_vm5, %v968_v30  ;;  %v1786_v32 = vpop.f32.mrb[39].mxu1 }
 0x201   :  { %v1059_v33 = vpop.f32.mrb[40].mxu1 }
 0x202   :  { %1067 = vst.msk [vmem:[#allocation2 + $0xa0] sm:$0xff] %vm126_vm5, %v1059_v33  ;;  %v1797_v34 = vpop.f32.mrb[41].mxu1 }
 0x203   :  { %v1062_v35 = vpop.f32.mrb[42].mxu1 }
 0x204   :  { %1068 = vst.msk [vmem:[#allocation2 + $0xa8] sm:$0xff] %vm126_vm5, %v1062_v35  ;;  %v1798_v36 = vpop.f32.mrb[43].mxu1 }
 0x209   :  { %v1153_v37 = vpop.f32.mrb[44].mxu1 }
 0x20a   :  { %1161 = vst.msk [vmem:[#allocation2 + $0xb0] sm:$0xff] %vm126_vm5, %v1153_v37  ;;  %v1809_v38 = vpop.f32.mrb[45].mxu1 }
 0x20b   :  { %v1156_v39 = vpop.f32.mrb[46].mxu1 }
 0x20c   :  { %1162 = vst.msk [vmem:[#allocation2 + $0xb8] sm:$0xff] %vm126_vm5, %v1156_v39  ;;  %v1810_v40 = vpop.f32.mrb[47].mxu1 }
 0x211   :  { %v1247_v41 = vpop.f32.mrb[48].mxu1 }
 0x212   :  { %1255 = vst.msk [vmem:[#allocation2 + $0xc0] sm:$0xff] %vm126_vm5, %v1247_v41  ;;  %v1821_v42 = vpop.f32.mrb[49].mxu1 }
 0x213   :  { %v1250_v43 = vpop.f32.mrb[50].mxu1 }
 0x214   :  { %1256 = vst.msk [vmem:[#allocation2 + $0xc8] sm:$0xff] %vm126_vm5, %v1250_v43  ;;  %v1822_v44 = vpop.f32.mrb[51].mxu1 }
 0x219   :  { %v1341_v45 = vpop.f32.mrb[52].mxu1 }
 0x21a   :  { %1349 = vst.msk [vmem:[#allocation2 + $0xd0] sm:$0xff] %vm126_vm5, %v1341_v45  ;;  %v1833_v46 = vpop.f32.mrb[53].mxu1 }
 0x21b   :  { %v1344_v47 = vpop.f32.mrb[54].mxu1 }
 0x21c   :  { %1350 = vst.msk [vmem:[#allocation2 + $0xd8] sm:$0xff] %vm126_vm5, %v1344_v47  ;;  %v1834_v48 = vpop.f32.mrb[55].mxu1 }
 0x221   :  { %v1435_v49 = vpop.f32.mrb[56].mxu1 }
 0x222   :  { %1443 = vst.msk [vmem:[#allocation2 + $0xe0] sm:$0xff] %vm126_vm5, %v1435_v49  ;;  %v1845_v50 = vpop.f32.mrb[57].mxu1 }
 0x223   :  { %v1438_v51 = vpop.f32.mrb[58].mxu1 }
 0x224   :  { %1444 = vst.msk [vmem:[#allocation2 + $0xe8] sm:$0xff] %vm126_vm5, %v1438_v51  ;;  %v1846_v52 = vpop.f32.mrb[59].mxu1 }
 0x229   :  { %v1529_v53 = vpop.f32.mrb[60].mxu1 }
 0x22a   :  { %1537 = vst.msk [vmem:[#allocation2 + $0xf0] sm:$0xff] %vm126_vm5, %v1529_v53  ;;  %v1857_v54 = vpop.f32.mrb[61].mxu1 }
 0x22b   :  { %v1532_v55 = vpop.f32.mrb[62].mxu1 }
 0x22c   :  { %1538 = vst.msk [vmem:[#allocation2 + $0xf8] sm:$0xff] %vm126_vm5, %v1532_v55  ;;  %v1858_v56 = vpop.f32.mrb[63].mxu1 }
 0x22d   :  { %1877 = shalt.err (!%p1874_p4)
}
 0x22e   :  { %s1878_s22 = scalar_lea.hbm %s2198_s3, 4096 }
 0x22f   :  { %p1879_p5 = scmp.ne.s32.totalorder %s2198_s3, %s1878_s22  ;;  %p1882_p6 = scmp.lt.u32.totalorder %s1878_s22, %s2198_s3 }
 0x231   :  { %p1884_p7 = pnand %p1882_p6, %p1879_p5 }
 0x233   :  { %1887 = shalt.err (!%p1884_p7)
}
 0x234   :  { %s1894_s27 = smov 128   ;;  %s1895_s28 = smov 8  }
 0x235   :  { %1550 = dma.vmem_to_hbm [thread:$0]  %s1545_s18, 4096, %s2198_s3, [#allocation3], %s1894_s27, %s1894_s27, %s1895_s28  }
 0x236   :  { %1888 = dma.done.wait [#allocation3], 4096  }
 0x237   :  { %1889 = vsyncadd [#allocation3], 4294963200 }
 0x238   :  { %1554 = vsyncpa [#allocation3], 1 }

</bundles_post_ra>
